<compile_context>
chip_gen: v6e
topology: v6e:2x2x1
jax: 0.10.0
libtpu: 0.0.40
codegen_flags: <defaults>
</compile_context>

<pallas_src>
import math
import numpy as np
import jax
import jax.numpy as jnp
from jax import lax
from jax.experimental import pallas as pl
from jax.experimental.pallas import tpu as pltpu

BN_EPS = 1e-5


# --------------------- host-side one-time preparation -----------------------

def build_encoder_forward(params, batch, seq_len):
    """One-time prep: weight transposes / im2col packing / BN packing into 2 slabs,
    plus the fused single-pallas_call forward."""
    blocks = params['blocks']
    wf = np.asarray(params['wf'], np.float32)          # (n_out, cin_f, window)
    bf = np.asarray(params['bf'], np.float32)
    n_out, cin_f, window = wf.shape

    # per-block static geometry (k=3, pad=1 convs)
    meta = []
    l_cur = seq_len
    for p in blocks:
        cin = int(p['w1'].shape[0])
        cout = int(p['w3'].shape[0])
        s = int(p['stride'])
        l_out = (l_cur + 2 - 3) // s + 1
        meta.append(dict(cin=cin, cout=cout, stride=s, l_in=l_cur, l_out=l_out))
        l_cur = l_out
    assert l_cur == window, (l_cur, window)            # final conv eats the whole length

    # common lane width for both slabs (everything here is <= 128 lanes)
    wmax = max([n_out, cin_f] + [m['cin'] for m in meta] + [m['cout'] for m in meta]
               + [m['l_in'] for m in meta if m['stride'] != 1])

    W_ALIGN, F_ALIGN = 16, 8   # bf16 / f32 sublane-tile row alignment for slab entries

    w_rows, w_count = [], 0
    def add_w(a):
        nonlocal w_count
        a = np.asarray(a, np.float32)
        r, c = a.shape
        rp = -(-r // W_ALIGN) * W_ALIGN
        buf = np.zeros((rp, wmax), np.float32)
        buf[:r, :c] = a
        w_rows.append(buf)
        off = w_count
        w_count += rp
        return off

    f_rows, f_count = [], 0
    def add_f(a):
        nonlocal f_count
        a = np.asarray(a, np.float32)
        r, c = a.shape
        rp = -(-r // F_ALIGN) * F_ALIGN
        buf = np.zeros((rp, wmax), np.float32)
        buf[:r, :c] = a
        f_rows.append(buf)
        off = f_count
        f_count += rp
        return off

    offs = []
    for p, m in zip(blocks, meta):
        cin, cout, s, l_in, l_out = m['cin'], m['cout'], m['stride'], m['l_in'], m['l_out']
        o = {}
        # 1x1 convs as (Cin, Cout) matmuls
        o['w1'] = add_w(np.asarray(p['w1'], np.float32).reshape(cin, cin).T)
        # k=3 convs packed for fused im2col matmul: row j*Cin + c_in, col c_out
        o['w2'] = add_w(np.transpose(np.asarray(p['w2'], np.float32), (2, 1, 0)).reshape(3 * cin, cin))
        o['w3'] = add_w(np.asarray(p['w3'], np.float32).reshape(cout, cin).T)
        o['wd'] = add_w(np.transpose(np.asarray(p['wd'], np.float32), (2, 1, 0)).reshape(3 * cin, cout))
        # stride-2 row selection: tiny batch-independent 0/1 matrix (exact in bf16)
        if s != 1:
            d = np.zeros((l_out, l_in), np.float32)
            d[np.arange(l_out), np.arange(l_out) * s] = 1.0
            o['d'] = add_w(d)
        else:
            o['d'] = None
        # BN packs (gamma/beta) stay f32
        o['bn_in'] = add_f(np.stack([np.asarray(p['g1']), np.asarray(p['be1']),
                                     np.asarray(p['g2']), np.asarray(p['be2'])]).astype(np.float32))
        o['bn_out'] = add_f(np.stack([np.asarray(p['g3']), np.asarray(p['be3']),
                                      np.asarray(p['g4']), np.asarray(p['be4'])]).astype(np.float32))
        offs.append(o)

    # final conv flattened to one (window*Cin, n_out) matmul + bias
    off_wf = add_w(np.transpose(wf, (2, 1, 0)).reshape(window * cin_f, n_out))
    off_bf = add_f(bf.reshape(1, n_out))

    w_slab = jnp.asarray(np.concatenate(w_rows, axis=0), jnp.bfloat16)   # matmul operands: bf16
    f_slab = jnp.asarray(np.concatenate(f_rows, axis=0), jnp.float32)    # BN/bias: f32

    # ------------------------------ fused kernel -----------------------------
    def kernel(x_ref, w_ref, f_ref, o_ref):

        def batchnorm(y, off, g_row, b_row, cols, relu):
            # training-mode BatchNorm1d over all B*L_out rows; variance from
            # CENTERED values (two-pass) to avoid E[y^2]-E[y]^2 cancellation.
            n_rows = y.shape[0]
            gamma = f_ref[off + g_row: off + g_row + 1, 0:cols]
            beta = f_ref[off + b_row: off + b_row + 1, 0:cols]
            mean = jnp.sum(y, axis=0, keepdims=True) * (1.0 / n_rows)
            yc = y - mean
            var = jnp.sum(yc * yc, axis=0, keepdims=True) * (1.0 / n_rows)
            out = yc * lax.rsqrt(var + BN_EPS) * gamma + beta
            return jnp.maximum(out, 0.0) if relu else out

        def conv_k3(h_bf, w_off, cin, cout, l_in, l_out, stride, d_off):
            # Conv1d(k=3, stride, pad=1) on channels-last rows.
            # Per batch: zero-pad, build in-register im2col (taps in adjacent lane
            # slices), optionally stride-select rows with the tiny constant D,
            # then ONE fused (3*Cin)-deep MXU matmul for all batches.
            zrow = jnp.zeros((1, cin), h_bf.dtype)
            per_b = []
            for b in range(batch):
                xb = h_bf[b * l_in:(b + 1) * l_in, :]
                xp = jnp.concatenate([zrow, xb, zrow], axis=0)                 # (L+2, Cin)
                im2 = jnp.concatenate([xp[j:j + l_in, :] for j in range(3)],
                                      axis=1)                                  # (L, 3*Cin)
                if stride != 1:
                    d = w_ref[d_off:d_off + l_out, 0:l_in]                     # (L_out, L) 0/1
                    im2 = jnp.dot(d, im2,
                                  preferred_element_type=jnp.float32).astype(h_bf.dtype)
                per_b.append(im2)
            im2 = jnp.concatenate(per_b, axis=0) if batch > 1 else per_b[0]    # (B*L_out, 3*Cin)
            wk = w_ref[w_off:w_off + 3 * cin, 0:cout]                          # (3*Cin, Cout)
            return jnp.dot(im2, wk, preferred_element_type=jnp.float32)

        h = x_ref[...]                                     # (B*L, C) channels-last, bf16
        for o, m in zip(offs, meta):
            cin, cout, s = m['cin'], m['cout'], m['stride']
            l_in, l_out = m['l_in'], m['l_out']
            # conv1 (1x1) + bn1 + ReLU    (conv biases cancel under training-mode BN)
            w1 = w_ref[o['w1']:o['w1'] + cin, 0:cin]
            y = jnp.dot(h, w1, preferred_element_type=jnp.float32)
            y = batchnorm(y, o['bn_in'], 0, 1, cin, relu=True)
            # conv2 (k=3, stride, pad=1) + bn2 + ReLU
            y = conv_k3(y.astype(jnp.bfloat16), o['w2'], cin, cin, l_in, l_out, s, o['d'])
            y = batchnorm(y, o['bn_in'], 2, 3, cin, relu=True)
            # conv3 (1x1) + bn3
            w3 = w_ref[o['w3']:o['w3'] + cin, 0:cout]
            y = jnp.dot(y.astype(jnp.bfloat16), w3, preferred_element_type=jnp.float32)
            y = batchnorm(y, o['bn_out'], 0, 1, cout, relu=False)
            # residual = bn4(down_sample(block input))  (k=3, stride, pad=1)
            r = conv_k3(h, o['wd'], cin, cout, l_in, l_out, s, o['d'])
            r = batchnorm(r, o['bn_out'], 2, 3, cout, relu=False)
            h = jnp.maximum(y + r, 0.0).astype(jnp.bfloat16)

        # final Conv1d(kernel=window, L_out=1): flatten each batch's rows into lanes
        # (slice+concat, layout-safe) and do ONE (window*Cin)-deep matmul + bias.
        flat = []
        for b in range(batch):
            rows = [h[b * window + l: b * window + l + 1, :] for l in range(window)]
            flat.append(jnp.concatenate(rows, axis=1))                         # (1, window*Cin)
        hf = jnp.concatenate(flat, axis=0) if batch > 1 else flat[0]           # (B, window*Cin)
        wff = w_ref[off_wf:off_wf + window * cin_f, 0:n_out]
        bias = f_ref[off_bf:off_bf + 1, 0:n_out]
        # NOTE: n_out < 128 -> masked store; negligible at B=2 (pad to 128 when scaling).
        o_ref[...] = jnp.dot(hf, wff, preferred_element_type=jnp.float32) + bias

    vmem = pl.BlockSpec(memory_space=pltpu.MemorySpace.VMEM)
    call = pl.pallas_call(
        kernel,
        out_shape=jax.ShapeDtypeStruct((batch, n_out), jnp.float32),
        in_specs=[vmem, vmem, vmem],
        out_specs=vmem,
    )

    @jax.jit
    def forward(x):
        # channels-last end-to-end: (B, seq_len, n_features) -> (B*L, C); cast matmul
        # operand to bf16 at the boundary (BN/elementwise stay f32 inside).
        return call(x.reshape(batch * seq_len, -1).astype(jnp.bfloat16), w_slab, f_slab)

    return forward


# ----------------------------- parameters ----------------------------------

def init_params(key, n_features=4, n_hidden=32, n_output=16, n_layers=3, seq_len=16):
    kit = iter(jax.random.split(key, 64))

    def conv(cout, cin, k):
        w = jax.random.normal(next(kit), (cout, cin, k), jnp.float32) / math.sqrt(cin * k)
        b = 0.1 * jax.random.normal(next(kit), (cout,), jnp.float32)
        return w, b

    def bn(c):
        g = 1.0 + 0.1 * jax.random.normal(next(kit), (c,), jnp.float32)
        be = 0.1 * jax.random.normal(next(kit), (c,), jnp.float32)
        return g, be

    def block(cin, cout, stride):
        p = {'stride': stride}
        p['w1'], p['b1'] = conv(cin, cin, 1)
        p['w2'], p['b2'] = conv(cin, cin, 3)
        p['w3'], p['b3'] = conv(cout, cin, 1)
        p['wd'], p['bd'] = conv(cout, cin, 3)     # down_sample conv
        p['g1'], p['be1'] = bn(cin)
        p['g2'], p['be2'] = bn(cin)
        p['g3'], p['be3'] = bn(cout)
        p['g4'], p['be4'] = bn(cout)
        return p

    # first layer: conv_param (3, 1, 1)
    blocks = [block(n_features, n_hidden, 1)]
    in_dim = n_hidden
    window = seq_len
    # middle layers: conv_param (3, 2, 1)
    for i in range(n_layers - 2):
        out_dim = n_hidden * 2 ** i
        blocks.append(block(in_dim, out_dim, 2))
        in_dim = out_dim
        window = int(np.floor((window + 2 - 3) / 2) + 1)
    wf, bf = conv(n_output, in_dim, int(window))
    return {'blocks': blocks, 'wf': wf, 'bf': bf}


# ----------------------------- pure-JAX reference --------------------------

def _conv1d_ref(x, w, b, stride, pad):
    out = lax.conv_general_dilated(x, w, (stride,), [(pad, pad)],
                                   dimension_numbers=('NCH', 'OIH', 'NCH'),
                                   precision=lax.Precision.HIGHEST)
    return out + b.reshape(1, -1, 1)


def _bn_ref(y, g, be):
    mean = jnp.mean(y, axis=(0, 2), keepdims=True)
    var = jnp.mean((y - mean) ** 2, axis=(0, 2), keepdims=True)
    return (y - mean) * lax.rsqrt(var + BN_EPS) * g.reshape(1, -1, 1) + be.reshape(1, -1, 1)


def reference_forward(x, params):
    z = jnp.transpose(x, (0, 2, 1))
    for p in params['blocks']:
        s = p['stride']
        h = jax.nn.relu(_bn_ref(_conv1d_ref(z, p['w1'], p['b1'], 1, 0), p['g1'], p['be1']))
        h = jax.nn.relu(_bn_ref(_conv1d_ref(h, p['w2'], p['b2'], s, 1), p['g2'], p['be2']))
        h3 = _bn_ref(_conv1d_ref(h, p['w3'], p['b3'], 1, 0), p['g3'], p['be3'])
        res = _bn_ref(_conv1d_ref(z, p['wd'], p['bd'], s, 1), p['g4'], p['be4'])
        z = jax.nn.relu(h3 + res)
    z = _conv1d_ref(z, params['wf'], params['bf'], 1, 0)
    return z[:, :, 0]


# ----------------------------- main -----------------------------------------

if __name__ == "__main__":
    key = jax.random.PRNGKey(0)
    pkey, xkey = jax.random.split(key)

    B, seq_len, n_features = 2, 16, 4
    n_hidden, n_output, n_layers = 32, 16, 3

    params = init_params(pkey, n_features, n_hidden, n_output, n_layers, seq_len)
    x = jax.random.normal(xkey, (B, seq_len, n_features), jnp.float32)

    forward = build_encoder_forward(params, B, seq_len)   # one-time param prep
    out = jax.block_until_ready(forward(x))
    assert out.shape == (B, n_output), out.shape

    ref = jax.block_until_ready(reference_forward(x, params))
    # Kernel uses bf16 MXU operands with f32 accumulation / f32 BN; reference is
    # HIGHEST-precision f32, so allow 2e-2.
    np.testing.assert_allclose(np.asarray(out), np.asarray(ref), rtol=2e-2, atol=2e-2)
    print("KERNEL_OK")
</pallas_src>

<mosaic_0001>
module attributes {stable_mosaic.version = 11 : i64} {
  func.func @kernel(%arg0: memref<32x4xbf16, #tpu.memory_space<vmem>>, %arg1: memref<592x32xbf16, #tpu.memory_space<vmem>>, %arg2: memref<40x32xf32, #tpu.memory_space<vmem>>, %arg3: memref<2x16xf32, #tpu.memory_space<vmem>>) attributes {dimension_semantics = [], scalar_prefetch = 0 : i64, scratch_operands = 0 : i64, tpu.core_type = #tpu.core_type<tc>} {
    %c0 = arith.constant 0 : index
    %c0_0 = arith.constant 0 : index
    %0 = vector.load %arg0[%c0, %c0_0] : memref<32x4xbf16, #tpu.memory_space<vmem>>, vector<32x4xbf16>
    %c0_1 = arith.constant 0 : index
    %c0_2 = arith.constant 0 : index
    %1 = vector.load %arg1[%c0_1, %c0_2] : memref<592x32xbf16, #tpu.memory_space<vmem>>, vector<4x4xbf16>
    %cst = arith.constant dense<0.000000e+00> : vector<32x4xf32>
    %2 = tpu.matmul %0, %1, %cst {dimension_numbers = #tpu.dot_dimension_numbers<[1], [0], [0], [1], [0, 0, 1, 1], [], []>} : vector<32x4xbf16>, vector<4x4xbf16>, vector<32x4xf32> -> vector<32x4xf32>
    %c0_3 = arith.constant 0 : index
    %c0_4 = arith.constant 0 : index
    %3 = vector.load %arg2[%c0_3, %c0_4] : memref<40x32xf32, #tpu.memory_space<vmem>>, vector<1x4xf32>
    %c1 = arith.constant 1 : index
    %c0_5 = arith.constant 0 : index
    %4 = vector.load %arg2[%c1, %c0_5] : memref<40x32xf32, #tpu.memory_space<vmem>>, vector<1x4xf32>
    %cst_6 = arith.constant dense<0.000000e+00> : vector<4xf32>
    %5 = vector.multi_reduction <add>, %2, %cst_6 [0] : vector<32x4xf32> to vector<4xf32>
    %6 = vector.shape_cast %5 : vector<4xf32> to vector<1x4xf32>
    %cst_7 = arith.constant 3.125000e-02 : f32
    %7 = vector.broadcast %cst_7 : f32 to vector<1x4xf32>
    %8 = arith.mulf %6, %7 : vector<1x4xf32>
    %9 = vector.broadcast %8 : vector<1x4xf32> to vector<32x4xf32>
    %10 = arith.subf %2, %9 : vector<32x4xf32>
    %11 = arith.mulf %10, %10 : vector<32x4xf32>
    %cst_8 = arith.constant dense<0.000000e+00> : vector<4xf32>
    %12 = vector.multi_reduction <add>, %11, %cst_8 [0] : vector<32x4xf32> to vector<4xf32>
    %13 = vector.shape_cast %12 : vector<4xf32> to vector<1x4xf32>
    %cst_9 = arith.constant 3.125000e-02 : f32
    %14 = vector.broadcast %cst_9 : f32 to vector<1x4xf32>
    %15 = arith.mulf %13, %14 : vector<1x4xf32>
    %cst_10 = arith.constant 9.99999974E-6 : f32
    %16 = vector.broadcast %cst_10 : f32 to vector<1x4xf32>
    %17 = arith.addf %15, %16 : vector<1x4xf32>
    %18 = math.rsqrt %17 : vector<1x4xf32>
    %19 = vector.broadcast %18 : vector<1x4xf32> to vector<32x4xf32>
    %20 = arith.mulf %10, %19 : vector<32x4xf32>
    %21 = vector.broadcast %3 : vector<1x4xf32> to vector<32x4xf32>
    %22 = arith.mulf %20, %21 : vector<32x4xf32>
    %23 = vector.broadcast %4 : vector<1x4xf32> to vector<32x4xf32>
    %24 = arith.addf %22, %23 : vector<32x4xf32>
    %cst_11 = arith.constant 0.000000e+00 : f32
    %25 = vector.broadcast %cst_11 : f32 to vector<32x4xf32>
    %26 = arith.maximumf %24, %25 : vector<32x4xf32>
    %27 = arith.truncf %26 : vector<32x4xf32> to vector<32x4xbf16>
    %cst_12 = arith.constant 0.000000e+00 : bf16
    %28 = vector.broadcast %cst_12 : bf16 to vector<1x4xbf16>
    %29 = vector.extract_strided_slice %27 {offsets = [0, 0], sizes = [16, 4], strides = [1, 1]} : vector<32x4xbf16> to vector<16x4xbf16>
    %30 = tpu.concatenate %28, %29, %28 in 0 : vector<1x4xbf16>, vector<16x4xbf16>, vector<1x4xbf16> -> vector<18x4xbf16>
    %31 = vector.extract_strided_slice %30 {offsets = [0, 0], sizes = [16, 4], strides = [1, 1]} : vector<18x4xbf16> to vector<16x4xbf16>
    %32 = vector.extract_strided_slice %30 {offsets = [1, 0], sizes = [16, 4], strides = [1, 1]} : vector<18x4xbf16> to vector<16x4xbf16>
    %33 = vector.extract_strided_slice %30 {offsets = [2, 0], sizes = [16, 4], strides = [1, 1]} : vector<18x4xbf16> to vector<16x4xbf16>
    %34 = tpu.concatenate %31, %32, %33 in 1 : vector<16x4xbf16>, vector<16x4xbf16>, vector<16x4xbf16> -> vector<16x12xbf16>
    %35 = vector.extract_strided_slice %27 {offsets = [16, 0], sizes = [16, 4], strides = [1, 1]} : vector<32x4xbf16> to vector<16x4xbf16>
    %36 = tpu.concatenate %28, %35, %28 in 0 : vector<1x4xbf16>, vector<16x4xbf16>, vector<1x4xbf16> -> vector<18x4xbf16>
    %37 = vector.extract_strided_slice %36 {offsets = [0, 0], sizes = [16, 4], strides = [1, 1]} : vector<18x4xbf16> to vector<16x4xbf16>
    %38 = vector.extract_strided_slice %36 {offsets = [1, 0], sizes = [16, 4], strides = [1, 1]} : vector<18x4xbf16> to vector<16x4xbf16>
    %39 = vector.extract_strided_slice %36 {offsets = [2, 0], sizes = [16, 4], strides = [1, 1]} : vector<18x4xbf16> to vector<16x4xbf16>
    %40 = tpu.concatenate %37, %38, %39 in 1 : vector<16x4xbf16>, vector<16x4xbf16>, vector<16x4xbf16> -> vector<16x12xbf16>
    %41 = tpu.concatenate %34, %40 in 0 : vector<16x12xbf16>, vector<16x12xbf16> -> vector<32x12xbf16>
    %c16 = arith.constant 16 : index
    %c0_13 = arith.constant 0 : index
    %42 = vector.load %arg1[%c16, %c0_13] : memref<592x32xbf16, #tpu.memory_space<vmem>>, vector<12x4xbf16>
    %cst_14 = arith.constant dense<0.000000e+00> : vector<32x4xf32>
    %43 = tpu.matmul %41, %42, %cst_14 {dimension_numbers = #tpu.dot_dimension_numbers<[1], [0], [0], [1], [0, 0, 1, 1], [], []>} : vector<32x12xbf16>, vector<12x4xbf16>, vector<32x4xf32> -> vector<32x4xf32>
    %c2 = arith.constant 2 : index
    %c0_15 = arith.constant 0 : index
    %44 = vector.load %arg2[%c2, %c0_15] : memref<40x32xf32, #tpu.memory_space<vmem>>, vector<1x4xf32>
    %c3 = arith.constant 3 : index
    %c0_16 = arith.constant 0 : index
    %45 = vector.load %arg2[%c3, %c0_16] : memref<40x32xf32, #tpu.memory_space<vmem>>, vector<1x4xf32>
    %cst_17 = arith.constant dense<0.000000e+00> : vector<4xf32>
    %46 = vector.multi_reduction <add>, %43, %cst_17 [0] : vector<32x4xf32> to vector<4xf32>
    %47 = vector.shape_cast %46 : vector<4xf32> to vector<1x4xf32>
    %cst_18 = arith.constant 3.125000e-02 : f32
    %48 = vector.broadcast %cst_18 : f32 to vector<1x4xf32>
    %49 = arith.mulf %47, %48 : vector<1x4xf32>
    %50 = vector.broadcast %49 : vector<1x4xf32> to vector<32x4xf32>
    %51 = arith.subf %43, %50 : vector<32x4xf32>
    %52 = arith.mulf %51, %51 : vector<32x4xf32>
    %cst_19 = arith.constant dense<0.000000e+00> : vector<4xf32>
    %53 = vector.multi_reduction <add>, %52, %cst_19 [0] : vector<32x4xf32> to vector<4xf32>
    %54 = vector.shape_cast %53 : vector<4xf32> to vector<1x4xf32>
    %cst_20 = arith.constant 3.125000e-02 : f32
    %55 = vector.broadcast %cst_20 : f32 to vector<1x4xf32>
    %56 = arith.mulf %54, %55 : vector<1x4xf32>
    %cst_21 = arith.constant 9.99999974E-6 : f32
    %57 = vector.broadcast %cst_21 : f32 to vector<1x4xf32>
    %58 = arith.addf %56, %57 : vector<1x4xf32>
    %59 = math.rsqrt %58 : vector<1x4xf32>
    %60 = vector.broadcast %59 : vector<1x4xf32> to vector<32x4xf32>
    %61 = arith.mulf %51, %60 : vector<32x4xf32>
    %62 = vector.broadcast %44 : vector<1x4xf32> to vector<32x4xf32>
    %63 = arith.mulf %61, %62 : vector<32x4xf32>
    %64 = vector.broadcast %45 : vector<1x4xf32> to vector<32x4xf32>
    %65 = arith.addf %63, %64 : vector<32x4xf32>
    %cst_22 = arith.constant 0.000000e+00 : f32
    %66 = vector.broadcast %cst_22 : f32 to vector<32x4xf32>
    %67 = arith.maximumf %65, %66 : vector<32x4xf32>
    %c32 = arith.constant 32 : index
    %c0_23 = arith.constant 0 : index
    %68 = vector.load %arg1[%c32, %c0_23] : memref<592x32xbf16, #tpu.memory_space<vmem>>, vector<4x32xbf16>
    %69 = arith.truncf %67 : vector<32x4xf32> to vector<32x4xbf16>
    %cst_24 = arith.constant dense<0.000000e+00> : vector<32x32xf32>
    %70 = tpu.matmul %69, %68, %cst_24 {dimension_numbers = #tpu.dot_dimension_numbers<[1], [0], [0], [1], [0, 0, 1, 1], [], []>} : vector<32x4xbf16>, vector<4x32xbf16>, vector<32x32xf32> -> vector<32x32xf32>
    %c8 = arith.constant 8 : index
    %c0_25 = arith.constant 0 : index
    %71 = vector.load %arg2[%c8, %c0_25] : memref<40x32xf32, #tpu.memory_space<vmem>>, vector<1x32xf32>
    %c9 = arith.constant 9 : index
    %c0_26 = arith.constant 0 : index
    %72 = vector.load %arg2[%c9, %c0_26] : memref<40x32xf32, #tpu.memory_space<vmem>>, vector<1x32xf32>
    %cst_27 = arith.constant dense<0.000000e+00> : vector<32xf32>
    %73 = vector.multi_reduction <add>, %70, %cst_27 [0] : vector<32x32xf32> to vector<32xf32>
    %74 = vector.shape_cast %73 : vector<32xf32> to vector<1x32xf32>
    %cst_28 = arith.constant 3.125000e-02 : f32
    %75 = vector.broadcast %cst_28 : f32 to vector<1x32xf32>
    %76 = arith.mulf %74, %75 : vector<1x32xf32>
    %77 = vector.broadcast %76 : vector<1x32xf32> to vector<32x32xf32>
    %78 = arith.subf %70, %77 : vector<32x32xf32>
    %79 = arith.mulf %78, %78 : vector<32x32xf32>
    %cst_29 = arith.constant dense<0.000000e+00> : vector<32xf32>
    %80 = vector.multi_reduction <add>, %79, %cst_29 [0] : vector<32x32xf32> to vector<32xf32>
    %81 = vector.shape_cast %80 : vector<32xf32> to vector<1x32xf32>
    %cst_30 = arith.constant 3.125000e-02 : f32
    %82 = vector.broadcast %cst_30 : f32 to vector<1x32xf32>
    %83 = arith.mulf %81, %82 : vector<1x32xf32>
    %cst_31 = arith.constant 9.99999974E-6 : f32
    %84 = vector.broadcast %cst_31 : f32 to vector<1x32xf32>
    %85 = arith.addf %83, %84 : vector<1x32xf32>
    %86 = math.rsqrt %85 : vector<1x32xf32>
    %87 = vector.broadcast %86 : vector<1x32xf32> to vector<32x32xf32>
    %88 = arith.mulf %78, %87 : vector<32x32xf32>
    %89 = vector.broadcast %71 : vector<1x32xf32> to vector<32x32xf32>
    %90 = arith.mulf %88, %89 : vector<32x32xf32>
    %91 = vector.broadcast %72 : vector<1x32xf32> to vector<32x32xf32>
    %92 = arith.addf %90, %91 : vector<32x32xf32>
    %cst_32 = arith.constant 0.000000e+00 : bf16
    %93 = vector.broadcast %cst_32 : bf16 to vector<1x4xbf16>
    %94 = vector.extract_strided_slice %0 {offsets = [0, 0], sizes = [16, 4], strides = [1, 1]} : vector<32x4xbf16> to vector<16x4xbf16>
    %95 = tpu.concatenate %93, %94, %93 in 0 : vector<1x4xbf16>, vector<16x4xbf16>, vector<1x4xbf16> -> vector<18x4xbf16>
    %96 = vector.extract_strided_slice %95 {offsets = [0, 0], sizes = [16, 4], strides = [1, 1]} : vector<18x4xbf16> to vector<16x4xbf16>
    %97 = vector.extract_strided_slice %95 {offsets = [1, 0], sizes = [16, 4], strides = [1, 1]} : vector<18x4xbf16> to vector<16x4xbf16>
    %98 = vector.extract_strided_slice %95 {offsets = [2, 0], sizes = [16, 4], strides = [1, 1]} : vector<18x4xbf16> to vector<16x4xbf16>
    %99 = tpu.concatenate %96, %97, %98 in 1 : vector<16x4xbf16>, vector<16x4xbf16>, vector<16x4xbf16> -> vector<16x12xbf16>
    %100 = vector.extract_strided_slice %0 {offsets = [16, 0], sizes = [16, 4], strides = [1, 1]} : vector<32x4xbf16> to vector<16x4xbf16>
    %101 = tpu.concatenate %93, %100, %93 in 0 : vector<1x4xbf16>, vector<16x4xbf16>, vector<1x4xbf16> -> vector<18x4xbf16>
    %102 = vector.extract_strided_slice %101 {offsets = [0, 0], sizes = [16, 4], strides = [1, 1]} : vector<18x4xbf16> to vector<16x4xbf16>
    %103 = vector.extract_strided_slice %101 {offsets = [1, 0], sizes = [16, 4], strides = [1, 1]} : vector<18x4xbf16> to vector<16x4xbf16>
    %104 = vector.extract_strided_slice %101 {offsets = [2, 0], sizes = [16, 4], strides = [1, 1]} : vector<18x4xbf16> to vector<16x4xbf16>
    %105 = tpu.concatenate %102, %103, %104 in 1 : vector<16x4xbf16>, vector<16x4xbf16>, vector<16x4xbf16> -> vector<16x12xbf16>
    %106 = tpu.concatenate %99, %105 in 0 : vector<16x12xbf16>, vector<16x12xbf16> -> vector<32x12xbf16>
    %c48 = arith.constant 48 : index
    %c0_33 = arith.constant 0 : index
    %107 = vector.load %arg1[%c48, %c0_33] : memref<592x32xbf16, #tpu.memory_space<vmem>>, vector<12x32xbf16>
    %cst_34 = arith.constant dense<0.000000e+00> : vector<32x32xf32>
    %108 = tpu.matmul %106, %107, %cst_34 {dimension_numbers = #tpu.dot_dimension_numbers<[1], [0], [0], [1], [0, 0, 1, 1], [], []>} : vector<32x12xbf16>, vector<12x32xbf16>, vector<32x32xf32> -> vector<32x32xf32>
    %c10 = arith.constant 10 : index
    %c0_35 = arith.constant 0 : index
    %109 = vector.load %arg2[%c10, %c0_35] : memref<40x32xf32, #tpu.memory_space<vmem>>, vector<1x32xf32>
    %c11 = arith.constant 11 : index
    %c0_36 = arith.constant 0 : index
    %110 = vector.load %arg2[%c11, %c0_36] : memref<40x32xf32, #tpu.memory_space<vmem>>, vector<1x32xf32>
    %cst_37 = arith.constant dense<0.000000e+00> : vector<32xf32>
    %111 = vector.multi_reduction <add>, %108, %cst_37 [0] : vector<32x32xf32> to vector<32xf32>
    %112 = vector.shape_cast %111 : vector<32xf32> to vector<1x32xf32>
    %cst_38 = arith.constant 3.125000e-02 : f32
    %113 = vector.broadcast %cst_38 : f32 to vector<1x32xf32>
    %114 = arith.mulf %112, %113 : vector<1x32xf32>
    %115 = vector.broadcast %114 : vector<1x32xf32> to vector<32x32xf32>
    %116 = arith.subf %108, %115 : vector<32x32xf32>
    %117 = arith.mulf %116, %116 : vector<32x32xf32>
    %cst_39 = arith.constant dense<0.000000e+00> : vector<32xf32>
    %118 = vector.multi_reduction <add>, %117, %cst_39 [0] : vector<32x32xf32> to vector<32xf32>
    %119 = vector.shape_cast %118 : vector<32xf32> to vector<1x32xf32>
    %cst_40 = arith.constant 3.125000e-02 : f32
    %120 = vector.broadcast %cst_40 : f32 to vector<1x32xf32>
    %121 = arith.mulf %119, %120 : vector<1x32xf32>
    %cst_41 = arith.constant 9.99999974E-6 : f32
    %122 = vector.broadcast %cst_41 : f32 to vector<1x32xf32>
    %123 = arith.addf %121, %122 : vector<1x32xf32>
    %124 = math.rsqrt %123 : vector<1x32xf32>
    %125 = vector.broadcast %124 : vector<1x32xf32> to vector<32x32xf32>
    %126 = arith.mulf %116, %125 : vector<32x32xf32>
    %127 = vector.broadcast %109 : vector<1x32xf32> to vector<32x32xf32>
    %128 = arith.mulf %126, %127 : vector<32x32xf32>
    %129 = vector.broadcast %110 : vector<1x32xf32> to vector<32x32xf32>
    %130 = arith.addf %128, %129 : vector<32x32xf32>
    %131 = arith.addf %92, %130 : vector<32x32xf32>
    %cst_42 = arith.constant 0.000000e+00 : f32
    %132 = vector.broadcast %cst_42 : f32 to vector<32x32xf32>
    %133 = arith.maximumf %131, %132 : vector<32x32xf32>
    %134 = arith.truncf %133 : vector<32x32xf32> to vector<32x32xbf16>
    %c64 = arith.constant 64 : index
    %c0_43 = arith.constant 0 : index
    %135 = vector.load %arg1[%c64, %c0_43] : memref<592x32xbf16, #tpu.memory_space<vmem>>, vector<32x32xbf16>
    %cst_44 = arith.constant dense<0.000000e+00> : vector<32x32xf32>
    %136 = tpu.matmul %134, %135, %cst_44 {dimension_numbers = #tpu.dot_dimension_numbers<[1], [0], [0], [1], [0, 0, 1, 1], [], []>} : vector<32x32xbf16>, vector<32x32xbf16>, vector<32x32xf32> -> vector<32x32xf32>
    %c16_45 = arith.constant 16 : index
    %c0_46 = arith.constant 0 : index
    %137 = vector.load %arg2[%c16_45, %c0_46] : memref<40x32xf32, #tpu.memory_space<vmem>>, vector<1x32xf32>
    %c17 = arith.constant 17 : index
    %c0_47 = arith.constant 0 : index
    %138 = vector.load %arg2[%c17, %c0_47] : memref<40x32xf32, #tpu.memory_space<vmem>>, vector<1x32xf32>
    %cst_48 = arith.constant dense<0.000000e+00> : vector<32xf32>
    %139 = vector.multi_reduction <add>, %136, %cst_48 [0] : vector<32x32xf32> to vector<32xf32>
    %140 = vector.shape_cast %139 : vector<32xf32> to vector<1x32xf32>
    %cst_49 = arith.constant 3.125000e-02 : f32
    %141 = vector.broadcast %cst_49 : f32 to vector<1x32xf32>
    %142 = arith.mulf %140, %141 : vector<1x32xf32>
    %143 = vector.broadcast %142 : vector<1x32xf32> to vector<32x32xf32>
    %144 = arith.subf %136, %143 : vector<32x32xf32>
    %145 = arith.mulf %144, %144 : vector<32x32xf32>
    %cst_50 = arith.constant dense<0.000000e+00> : vector<32xf32>
    %146 = vector.multi_reduction <add>, %145, %cst_50 [0] : vector<32x32xf32> to vector<32xf32>
    %147 = vector.shape_cast %146 : vector<32xf32> to vector<1x32xf32>
    %cst_51 = arith.constant 3.125000e-02 : f32
    %148 = vector.broadcast %cst_51 : f32 to vector<1x32xf32>
    %149 = arith.mulf %147, %148 : vector<1x32xf32>
    %cst_52 = arith.constant 9.99999974E-6 : f32
    %150 = vector.broadcast %cst_52 : f32 to vector<1x32xf32>
    %151 = arith.addf %149, %150 : vector<1x32xf32>
    %152 = math.rsqrt %151 : vector<1x32xf32>
    %153 = vector.broadcast %152 : vector<1x32xf32> to vector<32x32xf32>
    %154 = arith.mulf %144, %153 : vector<32x32xf32>
    %155 = vector.broadcast %137 : vector<1x32xf32> to vector<32x32xf32>
    %156 = arith.mulf %154, %155 : vector<32x32xf32>
    %157 = vector.broadcast %138 : vector<1x32xf32> to vector<32x32xf32>
    %158 = arith.addf %156, %157 : vector<32x32xf32>
    %cst_53 = arith.constant 0.000000e+00 : f32
    %159 = vector.broadcast %cst_53 : f32 to vector<32x32xf32>
    %160 = arith.maximumf %158, %159 : vector<32x32xf32>
    %161 = arith.truncf %160 : vector<32x32xf32> to vector<32x32xbf16>
    %cst_54 = arith.constant 0.000000e+00 : bf16
    %162 = vector.broadcast %cst_54 : bf16 to vector<1x32xbf16>
    %163 = vector.extract_strided_slice %161 {offsets = [0, 0], sizes = [16, 32], strides = [1, 1]} : vector<32x32xbf16> to vector<16x32xbf16>
    %164 = tpu.concatenate %162, %163, %162 in 0 : vector<1x32xbf16>, vector<16x32xbf16>, vector<1x32xbf16> -> vector<18x32xbf16>
    %165 = vector.extract_strided_slice %164 {offsets = [0, 0], sizes = [16, 32], strides = [1, 1]} : vector<18x32xbf16> to vector<16x32xbf16>
    %166 = vector.extract_strided_slice %164 {offsets = [1, 0], sizes = [16, 32], strides = [1, 1]} : vector<18x32xbf16> to vector<16x32xbf16>
    %167 = vector.extract_strided_slice %164 {offsets = [2, 0], sizes = [16, 32], strides = [1, 1]} : vector<18x32xbf16> to vector<16x32xbf16>
    %168 = tpu.concatenate %165, %166, %167 in 1 : vector<16x32xbf16>, vector<16x32xbf16>, vector<16x32xbf16> -> vector<16x96xbf16>
    %c320 = arith.constant 320 : index
    %c0_55 = arith.constant 0 : index
    %169 = vector.load %arg1[%c320, %c0_55] : memref<592x32xbf16, #tpu.memory_space<vmem>>, vector<8x16xbf16>
    %cst_56 = arith.constant dense<0.000000e+00> : vector<8x96xf32>
    %170 = tpu.matmul %169, %168, %cst_56 {dimension_numbers = #tpu.dot_dimension_numbers<[1], [0], [0], [1], [0, 0, 1, 1], [], []>} : vector<8x16xbf16>, vector<16x96xbf16>, vector<8x96xf32> -> vector<8x96xf32>
    %171 = arith.truncf %170 : vector<8x96xf32> to vector<8x96xbf16>
    %172 = vector.extract_strided_slice %161 {offsets = [16, 0], sizes = [16, 32], strides = [1, 1]} : vector<32x32xbf16> to vector<16x32xbf16>
    %173 = tpu.concatenate %162, %172, %162 in 0 : vector<1x32xbf16>, vector<16x32xbf16>, vector<1x32xbf16> -> vector<18x32xbf16>
    %174 = vector.extract_strided_slice %173 {offsets = [0, 0], sizes = [16, 32], strides = [1, 1]} : vector<18x32xbf16> to vector<16x32xbf16>
    %175 = vector.extract_strided_slice %173 {offsets = [1, 0], sizes = [16, 32], strides = [1, 1]} : vector<18x32xbf16> to vector<16x32xbf16>
    %176 = vector.extract_strided_slice %173 {offsets = [2, 0], sizes = [16, 32], strides = [1, 1]} : vector<18x32xbf16> to vector<16x32xbf16>
    %177 = tpu.concatenate %174, %175, %176 in 1 : vector<16x32xbf16>, vector<16x32xbf16>, vector<16x32xbf16> -> vector<16x96xbf16>
    %c320_57 = arith.constant 320 : index
    %c0_58 = arith.constant 0 : index
    %178 = vector.load %arg1[%c320_57, %c0_58] : memref<592x32xbf16, #tpu.memory_space<vmem>>, vector<8x16xbf16>
    %cst_59 = arith.constant dense<0.000000e+00> : vector<8x96xf32>
    %179 = tpu.matmul %178, %177, %cst_59 {dimension_numbers = #tpu.dot_dimension_numbers<[1], [0], [0], [1], [0, 0, 1, 1], [], []>} : vector<8x16xbf16>, vector<16x96xbf16>, vector<8x96xf32> -> vector<8x96xf32>
    %180 = arith.truncf %179 : vector<8x96xf32> to vector<8x96xbf16>
    %181 = tpu.concatenate %171, %180 in 0 : vector<8x96xbf16>, vector<8x96xbf16> -> vector<16x96xbf16>
    %c96 = arith.constant 96 : index
    %c0_60 = arith.constant 0 : index
    %182 = vector.load %arg1[%c96, %c0_60] : memref<592x32xbf16, #tpu.memory_space<vmem>>, vector<96x32xbf16>
    %cst_61 = arith.constant dense<0.000000e+00> : vector<16x32xf32>
    %183 = tpu.matmul %181, %182, %cst_61 {dimension_numbers = #tpu.dot_dimension_numbers<[1], [0], [0], [1], [0, 0, 1, 1], [], []>} : vector<16x96xbf16>, vector<96x32xbf16>, vector<16x32xf32> -> vector<16x32xf32>
    %c18 = arith.constant 18 : index
    %c0_62 = arith.constant 0 : index
    %184 = vector.load %arg2[%c18, %c0_62] : memref<40x32xf32, #tpu.memory_space<vmem>>, vector<1x32xf32>
    %c19 = arith.constant 19 : index
    %c0_63 = arith.constant 0 : index
    %185 = vector.load %arg2[%c19, %c0_63] : memref<40x32xf32, #tpu.memory_space<vmem>>, vector<1x32xf32>
    %cst_64 = arith.constant dense<0.000000e+00> : vector<32xf32>
    %186 = vector.multi_reduction <add>, %183, %cst_64 [0] : vector<16x32xf32> to vector<32xf32>
    %187 = vector.shape_cast %186 : vector<32xf32> to vector<1x32xf32>
    %cst_65 = arith.constant 6.250000e-02 : f32
    %188 = vector.broadcast %cst_65 : f32 to vector<1x32xf32>
    %189 = arith.mulf %187, %188 : vector<1x32xf32>
    %190 = vector.broadcast %189 : vector<1x32xf32> to vector<16x32xf32>
    %191 = arith.subf %183, %190 : vector<16x32xf32>
    %192 = arith.mulf %191, %191 : vector<16x32xf32>
    %cst_66 = arith.constant dense<0.000000e+00> : vector<32xf32>
    %193 = vector.multi_reduction <add>, %192, %cst_66 [0] : vector<16x32xf32> to vector<32xf32>
    %194 = vector.shape_cast %193 : vector<32xf32> to vector<1x32xf32>
    %cst_67 = arith.constant 6.250000e-02 : f32
    %195 = vector.broadcast %cst_67 : f32 to vector<1x32xf32>
    %196 = arith.mulf %194, %195 : vector<1x32xf32>
    %cst_68 = arith.constant 9.99999974E-6 : f32
    %197 = vector.broadcast %cst_68 : f32 to vector<1x32xf32>
    %198 = arith.addf %196, %197 : vector<1x32xf32>
    %199 = math.rsqrt %198 : vector<1x32xf32>
    %200 = vector.broadcast %199 : vector<1x32xf32> to vector<16x32xf32>
    %201 = arith.mulf %191, %200 : vector<16x32xf32>
    %202 = vector.broadcast %184 : vector<1x32xf32> to vector<16x32xf32>
    %203 = arith.mulf %201, %202 : vector<16x32xf32>
    %204 = vector.broadcast %185 : vector<1x32xf32> to vector<16x32xf32>
    %205 = arith.addf %203, %204 : vector<16x32xf32>
    %cst_69 = arith.constant 0.000000e+00 : f32
    %206 = vector.broadcast %cst_69 : f32 to vector<16x32xf32>
    %207 = arith.maximumf %205, %206 : vector<16x32xf32>
    %c192 = arith.constant 192 : index
    %c0_70 = arith.constant 0 : index
    %208 = vector.load %arg1[%c192, %c0_70] : memref<592x32xbf16, #tpu.memory_space<vmem>>, vector<32x32xbf16>
    %209 = arith.truncf %207 : vector<16x32xf32> to vector<16x32xbf16>
    %cst_71 = arith.constant dense<0.000000e+00> : vector<16x32xf32>
    %210 = tpu.matmul %209, %208, %cst_71 {dimension_numbers = #tpu.dot_dimension_numbers<[1], [0], [0], [1], [0, 0, 1, 1], [], []>} : vector<16x32xbf16>, vector<32x32xbf16>, vector<16x32xf32> -> vector<16x32xf32>
    %c24 = arith.constant 24 : index
    %c0_72 = arith.constant 0 : index
    %211 = vector.load %arg2[%c24, %c0_72] : memref<40x32xf32, #tpu.memory_space<vmem>>, vector<1x32xf32>
    %c25 = arith.constant 25 : index
    %c0_73 = arith.constant 0 : index
    %212 = vector.load %arg2[%c25, %c0_73] : memref<40x32xf32, #tpu.memory_space<vmem>>, vector<1x32xf32>
    %cst_74 = arith.constant dense<0.000000e+00> : vector<32xf32>
    %213 = vector.multi_reduction <add>, %210, %cst_74 [0] : vector<16x32xf32> to vector<32xf32>
    %214 = vector.shape_cast %213 : vector<32xf32> to vector<1x32xf32>
    %cst_75 = arith.constant 6.250000e-02 : f32
    %215 = vector.broadcast %cst_75 : f32 to vector<1x32xf32>
    %216 = arith.mulf %214, %215 : vector<1x32xf32>
    %217 = vector.broadcast %216 : vector<1x32xf32> to vector<16x32xf32>
    %218 = arith.subf %210, %217 : vector<16x32xf32>
    %219 = arith.mulf %218, %218 : vector<16x32xf32>
    %cst_76 = arith.constant dense<0.000000e+00> : vector<32xf32>
    %220 = vector.multi_reduction <add>, %219, %cst_76 [0] : vector<16x32xf32> to vector<32xf32>
    %221 = vector.shape_cast %220 : vector<32xf32> to vector<1x32xf32>
    %cst_77 = arith.constant 6.250000e-02 : f32
    %222 = vector.broadcast %cst_77 : f32 to vector<1x32xf32>
    %223 = arith.mulf %221, %222 : vector<1x32xf32>
    %cst_78 = arith.constant 9.99999974E-6 : f32
    %224 = vector.broadcast %cst_78 : f32 to vector<1x32xf32>
    %225 = arith.addf %223, %224 : vector<1x32xf32>
    %226 = math.rsqrt %225 : vector<1x32xf32>
    %227 = vector.broadcast %226 : vector<1x32xf32> to vector<16x32xf32>
    %228 = arith.mulf %218, %227 : vector<16x32xf32>
    %229 = vector.broadcast %211 : vector<1x32xf32> to vector<16x32xf32>
    %230 = arith.mulf %228, %229 : vector<16x32xf32>
    %231 = vector.broadcast %212 : vector<1x32xf32> to vector<16x32xf32>
    %232 = arith.addf %230, %231 : vector<16x32xf32>
    %cst_79 = arith.constant 0.000000e+00 : bf16
    %233 = vector.broadcast %cst_79 : bf16 to vector<1x32xbf16>
    %234 = vector.extract_strided_slice %134 {offsets = [0, 0], sizes = [16, 32], strides = [1, 1]} : vector<32x32xbf16> to vector<16x32xbf16>
    %235 = tpu.concatenate %233, %234, %233 in 0 : vector<1x32xbf16>, vector<16x32xbf16>, vector<1x32xbf16> -> vector<18x32xbf16>
    %236 = vector.extract_strided_slice %235 {offsets = [0, 0], sizes = [16, 32], strides = [1, 1]} : vector<18x32xbf16> to vector<16x32xbf16>
    %237 = vector.extract_strided_slice %235 {offsets = [1, 0], sizes = [16, 32], strides = [1, 1]} : vector<18x32xbf16> to vector<16x32xbf16>
    %238 = vector.extract_strided_slice %235 {offsets = [2, 0], sizes = [16, 32], strides = [1, 1]} : vector<18x32xbf16> to vector<16x32xbf16>
    %239 = tpu.concatenate %236, %237, %238 in 1 : vector<16x32xbf16>, vector<16x32xbf16>, vector<16x32xbf16> -> vector<16x96xbf16>
    %c320_80 = arith.constant 320 : index
    %c0_81 = arith.constant 0 : index
    %240 = vector.load %arg1[%c320_80, %c0_81] : memref<592x32xbf16, #tpu.memory_space<vmem>>, vector<8x16xbf16>
    %cst_82 = arith.constant dense<0.000000e+00> : vector<8x96xf32>
    %241 = tpu.matmul %240, %239, %cst_82 {dimension_numbers = #tpu.dot_dimension_numbers<[1], [0], [0], [1], [0, 0, 1, 1], [], []>} : vector<8x16xbf16>, vector<16x96xbf16>, vector<8x96xf32> -> vector<8x96xf32>
    %242 = arith.truncf %241 : vector<8x96xf32> to vector<8x96xbf16>
    %243 = vector.extract_strided_slice %134 {offsets = [16, 0], sizes = [16, 32], strides = [1, 1]} : vector<32x32xbf16> to vector<16x32xbf16>
    %244 = tpu.concatenate %233, %243, %233 in 0 : vector<1x32xbf16>, vector<16x32xbf16>, vector<1x32xbf16> -> vector<18x32xbf16>
    %245 = vector.extract_strided_slice %244 {offsets = [0, 0], sizes = [16, 32], strides = [1, 1]} : vector<18x32xbf16> to vector<16x32xbf16>
    %246 = vector.extract_strided_slice %244 {offsets = [1, 0], sizes = [16, 32], strides = [1, 1]} : vector<18x32xbf16> to vector<16x32xbf16>
    %247 = vector.extract_strided_slice %244 {offsets = [2, 0], sizes = [16, 32], strides = [1, 1]} : vector<18x32xbf16> to vector<16x32xbf16>
    %248 = tpu.concatenate %245, %246, %247 in 1 : vector<16x32xbf16>, vector<16x32xbf16>, vector<16x32xbf16> -> vector<16x96xbf16>
    %c320_83 = arith.constant 320 : index
    %c0_84 = arith.constant 0 : index
    %249 = vector.load %arg1[%c320_83, %c0_84] : memref<592x32xbf16, #tpu.memory_space<vmem>>, vector<8x16xbf16>
    %cst_85 = arith.constant dense<0.000000e+00> : vector<8x96xf32>
    %250 = tpu.matmul %249, %248, %cst_85 {dimension_numbers = #tpu.dot_dimension_numbers<[1], [0], [0], [1], [0, 0, 1, 1], [], []>} : vector<8x16xbf16>, vector<16x96xbf16>, vector<8x96xf32> -> vector<8x96xf32>
    %251 = arith.truncf %250 : vector<8x96xf32> to vector<8x96xbf16>
    %252 = tpu.concatenate %242, %251 in 0 : vector<8x96xbf16>, vector<8x96xbf16> -> vector<16x96xbf16>
    %c224 = arith.constant 224 : index
    %c0_86 = arith.constant 0 : index
    %253 = vector.load %arg1[%c224, %c0_86] : memref<592x32xbf16, #tpu.memory_space<vmem>>, vector<96x32xbf16>
    %cst_87 = arith.constant dense<0.000000e+00> : vector<16x32xf32>
    %254 = tpu.matmul %252, %253, %cst_87 {dimension_numbers = #tpu.dot_dimension_numbers<[1], [0], [0], [1], [0, 0, 1, 1], [], []>} : vector<16x96xbf16>, vector<96x32xbf16>, vector<16x32xf32> -> vector<16x32xf32>
    %c26 = arith.constant 26 : index
    %c0_88 = arith.constant 0 : index
    %255 = vector.load %arg2[%c26, %c0_88] : memref<40x32xf32, #tpu.memory_space<vmem>>, vector<1x32xf32>
    %c27 = arith.constant 27 : index
    %c0_89 = arith.constant 0 : index
    %256 = vector.load %arg2[%c27, %c0_89] : memref<40x32xf32, #tpu.memory_space<vmem>>, vector<1x32xf32>
    %cst_90 = arith.constant dense<0.000000e+00> : vector<32xf32>
    %257 = vector.multi_reduction <add>, %254, %cst_90 [0] : vector<16x32xf32> to vector<32xf32>
    %258 = vector.shape_cast %257 : vector<32xf32> to vector<1x32xf32>
    %cst_91 = arith.constant 6.250000e-02 : f32
    %259 = vector.broadcast %cst_91 : f32 to vector<1x32xf32>
    %260 = arith.mulf %258, %259 : vector<1x32xf32>
    %261 = vector.broadcast %260 : vector<1x32xf32> to vector<16x32xf32>
    %262 = arith.subf %254, %261 : vector<16x32xf32>
    %263 = arith.mulf %262, %262 : vector<16x32xf32>
    %cst_92 = arith.constant dense<0.000000e+00> : vector<32xf32>
    %264 = vector.multi_reduction <add>, %263, %cst_92 [0] : vector<16x32xf32> to vector<32xf32>
    %265 = vector.shape_cast %264 : vector<32xf32> to vector<1x32xf32>
    %cst_93 = arith.constant 6.250000e-02 : f32
    %266 = vector.broadcast %cst_93 : f32 to vector<1x32xf32>
    %267 = arith.mulf %265, %266 : vector<1x32xf32>
    %cst_94 = arith.constant 9.99999974E-6 : f32
    %268 = vector.broadcast %cst_94 : f32 to vector<1x32xf32>
    %269 = arith.addf %267, %268 : vector<1x32xf32>
    %270 = math.rsqrt %269 : vector<1x32xf32>
    %271 = vector.broadcast %270 : vector<1x32xf32> to vector<16x32xf32>
    %272 = arith.mulf %262, %271 : vector<16x32xf32>
    %273 = vector.broadcast %255 : vector<1x32xf32> to vector<16x32xf32>
    %274 = arith.mulf %272, %273 : vector<16x32xf32>
    %275 = vector.broadcast %256 : vector<1x32xf32> to vector<16x32xf32>
    %276 = arith.addf %274, %275 : vector<16x32xf32>
    %277 = arith.addf %232, %276 : vector<16x32xf32>
    %cst_95 = arith.constant 0.000000e+00 : f32
    %278 = vector.broadcast %cst_95 : f32 to vector<16x32xf32>
    %279 = arith.maximumf %277, %278 : vector<16x32xf32>
    %280 = arith.truncf %279 : vector<16x32xf32> to vector<16x32xbf16>
    %281 = vector.extract_strided_slice %280 {offsets = [0, 0], sizes = [1, 32], strides = [1, 1]} : vector<16x32xbf16> to vector<1x32xbf16>
    %282 = vector.extract_strided_slice %280 {offsets = [1, 0], sizes = [1, 32], strides = [1, 1]} : vector<16x32xbf16> to vector<1x32xbf16>
    %283 = vector.extract_strided_slice %280 {offsets = [2, 0], sizes = [1, 32], strides = [1, 1]} : vector<16x32xbf16> to vector<1x32xbf16>
    %284 = vector.extract_strided_slice %280 {offsets = [3, 0], sizes = [1, 32], strides = [1, 1]} : vector<16x32xbf16> to vector<1x32xbf16>
    %285 = vector.extract_strided_slice %280 {offsets = [4, 0], sizes = [1, 32], strides = [1, 1]} : vector<16x32xbf16> to vector<1x32xbf16>
    %286 = vector.extract_strided_slice %280 {offsets = [5, 0], sizes = [1, 32], strides = [1, 1]} : vector<16x32xbf16> to vector<1x32xbf16>
    %287 = vector.extract_strided_slice %280 {offsets = [6, 0], sizes = [1, 32], strides = [1, 1]} : vector<16x32xbf16> to vector<1x32xbf16>
    %288 = vector.extract_strided_slice %280 {offsets = [7, 0], sizes = [1, 32], strides = [1, 1]} : vector<16x32xbf16> to vector<1x32xbf16>
    %289 = tpu.concatenate %281, %282, %283, %284, %285, %286, %287, %288 in 1 : vector<1x32xbf16>, vector<1x32xbf16>, vector<1x32xbf16>, vector<1x32xbf16>, vector<1x32xbf16>, vector<1x32xbf16>, vector<1x32xbf16>, vector<1x32xbf16> -> vector<1x256xbf16>
    %290 = vector.extract_strided_slice %280 {offsets = [8, 0], sizes = [1, 32], strides = [1, 1]} : vector<16x32xbf16> to vector<1x32xbf16>
    %291 = vector.extract_strided_slice %280 {offsets = [9, 0], sizes = [1, 32], strides = [1, 1]} : vector<16x32xbf16> to vector<1x32xbf16>
    %292 = vector.extract_strided_slice %280 {offsets = [10, 0], sizes = [1, 32], strides = [1, 1]} : vector<16x32xbf16> to vector<1x32xbf16>
    %293 = vector.extract_strided_slice %280 {offsets = [11, 0], sizes = [1, 32], strides = [1, 1]} : vector<16x32xbf16> to vector<1x32xbf16>
    %294 = vector.extract_strided_slice %280 {offsets = [12, 0], sizes = [1, 32], strides = [1, 1]} : vector<16x32xbf16> to vector<1x32xbf16>
    %295 = vector.extract_strided_slice %280 {offsets = [13, 0], sizes = [1, 32], strides = [1, 1]} : vector<16x32xbf16> to vector<1x32xbf16>
    %296 = vector.extract_strided_slice %280 {offsets = [14, 0], sizes = [1, 32], strides = [1, 1]} : vector<16x32xbf16> to vector<1x32xbf16>
    %297 = vector.extract_strided_slice %280 {offsets = [15, 0], sizes = [1, 32], strides = [1, 1]} : vector<16x32xbf16> to vector<1x32xbf16>
    %298 = tpu.concatenate %290, %291, %292, %293, %294, %295, %296, %297 in 1 : vector<1x32xbf16>, vector<1x32xbf16>, vector<1x32xbf16>, vector<1x32xbf16>, vector<1x32xbf16>, vector<1x32xbf16>, vector<1x32xbf16>, vector<1x32xbf16> -> vector<1x256xbf16>
    %299 = tpu.concatenate %289, %298 in 0 : vector<1x256xbf16>, vector<1x256xbf16> -> vector<2x256xbf16>
    %c336 = arith.constant 336 : index
    %c0_96 = arith.constant 0 : index
    %300 = vector.load %arg1[%c336, %c0_96] : memref<592x32xbf16, #tpu.memory_space<vmem>>, vector<256x16xbf16>
    %c32_97 = arith.constant 32 : index
    %c0_98 = arith.constant 0 : index
    %301 = vector.load %arg2[%c32_97, %c0_98] : memref<40x32xf32, #tpu.memory_space<vmem>>, vector<1x16xf32>
    %cst_99 = arith.constant dense<0.000000e+00> : vector<2x16xf32>
    %302 = tpu.matmul %299, %300, %cst_99 {dimension_numbers = #tpu.dot_dimension_numbers<[1], [0], [0], [1], [0, 0, 1, 1], [], []>} : vector<2x256xbf16>, vector<256x16xbf16>, vector<2x16xf32> -> vector<2x16xf32>
    %303 = vector.broadcast %301 : vector<1x16xf32> to vector<2x16xf32>
    %304 = arith.addf %302, %303 : vector<2x16xf32>
    %c0_100 = arith.constant 0 : index
    %c0_101 = arith.constant 0 : index
    %305 = vector.load %arg3[%c0_100, %c0_101] : memref<2x16xf32, #tpu.memory_space<vmem>>, vector<2x16xf32>
    tpu.vector_store %arg3[%c0_100, %c0_101], %304 {strides = array<i32>} : memref<2x16xf32, #tpu.memory_space<vmem>>, vector<2x16xf32>,
    return
  }
}

</mosaic_0001>

<bundles_post_ra>
// kernel: forward.1
= control target key start
LH: loop header
LB: loop body
LE: loop exit
PB: predicated region body
PF: predicated region fallthrough
CT: control target
= control target key end

     0   :  { %8 = vsyncpa [#allocation3], 0  ;;  %s2493_s0 = inlined_call_operand.vmem [shape: bf16[32,4], index: 0, kind: input, shape index: {}]   ;;  %s2494_s1 = inlined_call_operand.hbm [shape: bf16[592,32], index: 1, kind: input, shape index: {}]   ;;  %s2495_s2 = inlined_call_operand.hbm [shape: f32[40,32], index: 2, kind: input, shape index: {}]   ;;  %s2496_s3 = inlined_call_operand.hbm [shape: f32[2,16], index: 3, kind: output, shape index: {}]  }
   0x1   :  { %9 = vsyncpa [#allocation6], 0 }
   0x2   :  { %10 = vsyncpa [#allocation4], 0  ;;  %s2158_s12 = smov [#allocation2]  }
   0x3   :  { %s18_s13 = sshll.u32 %s2158_s12, 4  ;;  %s19_s13 = int_to_ptr.vmem [resolvable:$true] %s18_s13 }
   0x4   :  { %s2100_s14 = scalar_lea.vmem %s19_s13, 4736  ;;  %p2105_p1 = scmp.lt.s32.totalorder %s19_s13, %s19_s13 }
   0x5   :  { %p2101_p0 = scmp.ne.s32.totalorder %s19_s13, %s2100_s14  ;;  %p2106_p2 = scmp.lt.s32.totalorder %s2100_s14, %s2100_s14 }
   0x7   :  { %p2107_p3 = por %p2106_p2, %p2105_p1 }
   0x9   :  { %p2108_p4 = pnand %p2107_p3, %p2101_p0 }
   0xb   :  { %2111 = shalt.err (!%p2108_p4)
}
   0xc   :  { %s2159_s15 = smov 64   ;;  %s2160_s16 = smov 4  }
   0xd   :  { %24 = dma.hbm_to_vmem [thread:$0]  %s2494_s1, 4736, %s19_s13, [#allocation3], %s2159_s15, %s2159_s15, %s2160_s16  }
   0xe   :  { %s2161_s19 = smov [#allocation5]  }
   0xf   :  { %s30_s20 = sshll.u32 %s2161_s19, 4  ;;  %s31_s20 = int_to_ptr.vmem [resolvable:$true] %s30_s20 }
  0x10   :  { %s2120_s21 = scalar_lea.vmem %s31_s20, 640  ;;  %p2125_p6 = scmp.lt.s32.totalorder %s31_s20, %s31_s20 }
  0x11   :  { %p2121_p5 = scmp.ne.s32.totalorder %s31_s20, %s2120_s21  ;;  %p2126_p7 = scmp.lt.s32.totalorder %s2120_s21, %s2120_s21 }
  0x13   :  { %p2127_p8 = por %p2126_p7, %p2125_p6 }
  0x15   :  { %p2128_p9 = pnand %p2127_p8, %p2121_p5 }
  0x17   :  { %2131 = shalt.err (!%p2128_p9)
}
  0x18   :  { %s2162_s22 = smov 128   ;;  %s2163_s23 = smov 8  }
  0x19   :  { %36 = dma.hbm_to_vmem [thread:$0]  %s2495_s2, 640, %s31_s20, [#allocation6], %s2162_s22, %s2162_s22, %s2163_s23  }
  0x1a   :  { %2152 = dma.done.wait [#allocation3], 4736  }
  0x1b   :  { %2153 = vsyncadd [#allocation3], 4294962560 }
  0x1c   :  { %2154 = dma.done.wait [#allocation6], 640  }
  0x1d   :  { %2155 = vsyncadd [#allocation6], 4294966656  ;;  %vm66_vm0 = vcmask 1041408   ;;  %vm59_vm1 = vcmask 31744   ;;  %v48_v0 = vld [vmem:[#allocation2] sm:$0x3] }
  0x1e   :  { %2025 = vmatprep.subr.msk.bf16.mxu1 %vm66_vm0, %v48_v0  ;;  %v68_v1 = vsel %vm66_vm0, %v48_v0, 0  ;;  %v2204_v2 = vld [vmem:[%s2493_s0] sm:$0xff]   ;;  %v2209_v3 = vld [vmem:[%s2493_s0 + $0x8] sm:$0xff]   ;;  %vm194_vm2 = vcmask 1040384   ;;  %vm195_vm3 = vsmask.f32 256 }
  0x1f   :  { %1930 = vmatpush3.bf16.msra.mxu1 %v68_v1  ;;  %1931 = vmatprep.mubr.msk.bf16.mxu1 %vm59_vm1, %v2204_v2  ;;  %v1800_v46 = vld [vmem:[#allocation5] ss:$0 sm:$0xff]  ;;  %v1801_v51 = vld [vmem:[#allocation5 + $0x1] ss:$0 sm:$0xff]  ;;  %vm2223_vm4 = vmand %vm194_vm2, %vm195_vm3  ;;  %vm275_vm5 = vcmask 1045504   ;;  %vm216_vm7 = vcmask 1046528  }
  0x20   :  { %vm199_vm6 = vsmask.f32 7424  ;;  %vm224_vm8 = vcmask 64512   ;;  %vm270_vm9 = vcmask 97280   ;;  %vm455_vm10 = vcmask 261120   ;;  %s2166_s0 = smov 32  }
  0x21   :  { %vm2165_vm11 = vmmov 0   ;;  %vm888_vm12 = vcmask 523264   ;;  %vm893_vm13 = vcmask 130048   ;;  %vm1018_vm14 = vcmask 1043456   ;;  %s2167_s2 = smov 96   ;;  %s2168_s29 = smov [#allocation7]  }
  0x22   :  { %1932 = vmatmul.mubr.msk.bf16.vlgmr.msra.gmra.mxu1 %vm59_vm1, %v2209_v3  ;;  %vm1070_vm15 = vcmask 785408   ;;  %s1786_s30 = sshll.u32 %s2168_s29, 4  ;;  %s1787_s30 = int_to_ptr.vmem [resolvable:$true] %s1786_s30 }
  0x23   :  { %s2132_s4 = scalar_lea.vmem %s1787_s30, 32  ;;  %p2137_p11 = scmp.lt.s32.totalorder %s1787_s30, %s1787_s30 }
  0x24   :  { %p2133_p10 = scmp.ne.s32.totalorder %s1787_s30, %s2132_s4  ;;  %p2138_p12 = scmp.lt.s32.totalorder %s2132_s4, %s2132_s4 }
  0x26   :  { %p2139_p13 = por %p2138_p12, %p2137_p11 }
  0x28   :  { %p2140_p0 = pnand %p2139_p13, %p2133_p10 }
  0xe2   :  { %v1933_v4 = vpop.f32.mrf.mxu1 }
  0xe3   :  { %v124_v11 = vsel %vm59_vm1, %v1933_v4, 0.0 }
  0xe4   :  { %v104_v5 = vpop.f32.mrf.mxu1 }
  0xe5   :  { %v121_v8 = vsel %vm59_vm1, %v104_v5, 0.0 }
  0xe6   :  { %v1934_v6 = vpop.f32.mrf.mxu1 }
  0xe7   :  { %v126_v13 = vsel %vm59_vm1, %v1934_v6, 0.0 }
  0xe8   :  { %v107_v7 = vpop.f32.mrf.mxu1 }
  0xe9   :  { %v122_v9 = vsel %vm59_vm1, %v107_v7, 0.0 }
  0xea   :  { %v123_v10 = vadd.f32 %v122_v9, %v121_v8 }
  0xec   :  { %v125_v12 = vadd.f32 %v124_v11, %v123_v10  ;;  %v2042_v11 = vld [vmem:[#allocation2 + $0x8] sm:$0x3f]  }
  0xed   :  { %2026 = vmatprep.subr.msk.bf16.mxu1 %vm275_vm5, %v2042_v11 }
  0xee   :  { %v127_v14 = vadd.f32 %v126_v13, %v125_v12 }
  0xf0   :  { %v128_v15 = vrot.slane %v127_v14, 4 }
  0xf2   :  { %v129_v16 = vadd.f32 %v128_v15, %v127_v14  ;;  %v514_v15 = vshrl.u32 %v2204_v2, 16 }
  0xf4   :  { %v130_v17 = vrot.slane %v129_v16, 2 }
  0xf6   :  { %v131_v18 = vadd.f32 %v130_v17, %v129_v16 }
  0xf8   :  { %v132_v19 = vrot.slane %v131_v18, 1 }
  0xfa   :  { %v133_v20 = vadd.f32 %v132_v19, %v131_v18 }
  0xfc   :  { %v134_v21 = vmul.f32 0.03125, %v133_v20  ;;  %v277_v20 = vsel %vm275_vm5, %v2042_v11, 0 }
  0xfd   :  { %1936 = vmatpush3.bf16.msra.mxu1 %v277_v20  ;;  %v2043_v20 = vld [vmem:[#allocation2 + $0x18] sm:$0x3f]  }
  0xfe   :  { %v135_v22 = vsub.f32 %v104_v5, %v134_v21  ;;  %v136_v23 = vsub.f32 %v107_v7, %v134_v21  ;;  %v137_v24 = vsub.f32 %v1933_v4, %v134_v21  ;;  %v138_v25 = vsub.f32 %v1934_v6, %v134_v21  ;;  %2028 = vmatprep.subr.msk.bf16.mxu1 %vm275_vm5, %v2043_v20 }
  0xff   :  { %v517_v21 = vshll.u32 %v2204_v2, 16 }
 0x100   :  { %v139_v26 = vmul.f32 %v135_v22, %v135_v22  ;;  %v140_v27 = vmul.f32 %v136_v23, %v136_v23  ;;  %v141_v28 = vmul.f32 %v137_v24, %v137_v24  ;;  %v142_v29 = vmul.f32 %v138_v25, %v138_v25 }
 0x102   :  { %v143_v30 = vsel %vm59_vm1, %v139_v26, 0.0  ;;  %v144_v31 = vsel %vm59_vm1, %v140_v27, 0.0  ;;  %v146_v33 = vsel %vm59_vm1, %v141_v28, 0.0  ;;  %v148_v35 = vsel %vm59_vm1, %v142_v29, 0.0 }
 0x103   :  { %v145_v32 = vadd.f32 %v144_v31, %v143_v30  ;;  %v516_v29 = vrot.slane %v514_v15, 7  ;;  %v549_v30 = vshrl.u32 %v2209_v3, 16 }
 0x105   :  { %v147_v34 = vadd.f32 %v146_v33, %v145_v32 }
 0x107   :  { %v149_v36 = vadd.f32 %v148_v35, %v147_v34  ;;  %v519_v35 = vor.u32 %v517_v21, %v516_v29 }
 0x109   :  { %v150_v37 = vrot.slane %v149_v36, 4 }
 0x10b   :  { %v151_v38 = vadd.f32 %v150_v37, %v149_v36  ;;  %v523_v36 = vsel %vm2223_vm4, %v516_v29, 0  ;;  %v551_v37 = vrot.slane %v549_v30, 7 }
 0x10d   :  { %v152_v39 = vrot.slane %v151_v38, 2 }
 0x10f   :  { %v153_v40 = vadd.f32 %v152_v39, %v151_v38 }
 0x111   :  { %v154_v41 = vrot.slane %v153_v40, 1 }
 0x113   :  { %v155_v42 = vadd.f32 %v154_v41, %v153_v40  ;;  %v532_v41 = vshll.u32 %v523_v36, 16 }
 0x115   :  { %v156_v43 = vmul.f32 0.03125, %v155_v42 }
 0x117   :  { %v157_v44 = vadd.f32 1e-05, %v156_v43 }
 0x119   :  { %2076 = vrsqrt.f32 %v157_v44  ;;  %v558_v44 = vsel %vm2223_vm4, %v551_v37, 0 }
 0x126   :  { %v2077_v45 = vpop.eup %2076 }
 0x127   :  { %v159_v47 = vmul.f32 %v2077_v45, %v135_v22  ;;  %v160_v48 = vmul.f32 %v2077_v45, %v136_v23  ;;  %v161_v49 = vmul.f32 %v2077_v45, %v137_v24  ;;  %v162_v50 = vmul.f32 %v2077_v45, %v138_v25 }
 0x128   :  { %v552_v22 = vshll.u32 %v2209_v3, 16  ;;  %v522_v3 = vsel %vm2223_vm4, 0, %v519_v35 }
 0x129   :  { %v167_v52 = vmul.f32 %v1800_v46, %v159_v47  ;;  %v168_v53 = vmul.f32 %v1800_v46, %v160_v48  ;;  %v169_v54 = vmul.f32 %v1800_v46, %v161_v49  ;;  %v170_v55 = vmul.f32 %v1800_v46, %v162_v50 }
 0x12a   :  { %v554_v43 = vor.u32 %v552_v22, %v551_v37  ;;  %v525_v47 = vshrl.u32 %v522_v3, 16  ;;  %v527_v48 = vshll.u32 %v522_v3, 16  ;;  %v534_v49 = vrot.slane %v532_v41, 1 }
 0x12b   :  { %v176_v56 = vadd.f32 %v1801_v51, %v168_v53  ;;  %v177_v57 = vadd.f32 %v1801_v51, %v169_v54  ;;  %v178_v58 = vadd.f32 %v1801_v51, %v170_v55  ;;  %v175_v59 = vadd.f32 %v1801_v51, %v167_v52 }
 0x12c   :  { %v540_v50 = vrot.slane %v522_v3, 1  ;;  %v541_v51 = vrot.slane %v523_v36, 1  ;;  %v557_v52 = vsel %vm2223_vm4, 0, %v554_v43  ;;  %v529_v53 = vrot.slane %v527_v48, 1 }
 0x12d   :  { %v180_v60 = vmax.f32 %v176_v56, 0.0  ;;  %v181_v61 = vmax.f32 %v177_v57, 0.0  ;;  %v182_v62 = vmax.f32 %v178_v58, 0.0  ;;  %v179_v63 = vmax.f32 %v175_v59, 0.0 }
 0x12e   :  { %v560_v54 = vshrl.u32 %v557_v52, 16  ;;  %v562_v55 = vshll.u32 %v557_v52, 16  ;;  %v567_v56 = vshll.u32 %v558_v44, 16  ;;  %v530_v59 = vor.u32 %v529_v53, %v525_v47 }
 0x12f   :  { %v184_v0 = vpack.c.bf16 %v182_v62, %v181_v61  ;;  %v183_v1 = vpack.c.bf16 %v180_v60, %v179_v63  ;;  %v542_v61 = vsel %vm216_vm7, %v540_v50, %v541_v51  ;;  %v575_v62 = vrot.slane %v557_v52, 1 }
 0x130   :  { %v564_v60 = vrot.slane %v562_v55, 1  ;;  %v576_v63 = vrot.slane %v558_v44, 1 }
 0x131   :  { %v228_v4 = vshrl.u32 %v184_v0, 16  ;;  %v186_v5 = vshrl.u32 %v183_v1, 16  ;;  %v231_v7 = vshll.u32 %v184_v0, 16  ;;  %v189_v10 = vshll.u32 %v183_v1, 16 }
 0x132   :  { %v535_v0 = vsel %vm199_vm6, %v530_v59, %v534_v49  ;;  %v565_v1 = vor.u32 %v564_v60, %v560_v54 }
 0x133   :  { %v230_v8 = vrot.slane %v228_v4, 7  ;;  %v188_v9 = vrot.slane %v186_v5, 7  ;;  %v569_v4 = vrot.slane %v567_v56, 1  ;;  %v577_v5 = vsel %vm216_vm7, %v575_v62, %v576_v63 }
 0x135   :  { %v233_v12 = vor.u32 %v231_v7, %v230_v8  ;;  %v237_v13 = vsel %vm2223_vm4, %v230_v8, 0  ;;  %v191_v14 = vor.u32 %v189_v10, %v188_v9  ;;  %v198_v16 = vsel %vm2223_vm4, %v188_v9, 0 }
 0x136   :  { %v246_v18 = vshll.u32 %v237_v13, 16  ;;  %v208_v25 = vshll.u32 %v198_v16, 16  ;;  %v255_v26 = vrot.slane %v237_v13, 1  ;;  %v218_v33 = vrot.slane %v198_v16, 1 }
 0x137   :  { %v2235_v17 = vsel %vm2223_vm4, 0, %v233_v12  ;;  %v2239_v19 = vsel %vm2223_vm4, 0, %v191_v14  ;;  %v570_v7 = vsel %vm199_vm6, %v565_v1, %v569_v4 }
 0x138   :  { %v241_v23 = vshll.u32 %v2235_v17, 16  ;;  %v203_v24 = vshll.u32 %v2239_v19, 16  ;;  %v239_v27 = vshrl.u32 %v2235_v17, 16  ;;  %v248_v31 = vrot.slane %v246_v18, 1 }
 0x139   :  { %v201_v2 = vshrl.u32 %v2239_v19, 16  ;;  %v210_v39 = vrot.slane %v208_v25, 1  ;;  %v254_v40 = vrot.slane %v2235_v17, 1  ;;  %v217_v46 = vrot.slane %v2239_v19, 1 }
 0x13a   :  { %v243_v28 = vrot.slane %v241_v23, 1  ;;  %v205_v32 = vrot.slane %v203_v24, 1 }
 0x13b   :  { %v256_v57 = vsel %vm216_vm7, %v254_v40, %v255_v26  ;;  %v219_v58 = vsel %vm216_vm7, %v217_v46, %v218_v33  ;;  %v392_v26 = vld [vmem:[#allocation2 + $0x10] sm:$0x3] }
 0x13c   :  { %v244_v34 = vor.u32 %v243_v28, %v239_v27  ;;  %v206_v38 = vor.u32 %v205_v32, %v201_v2  ;;  %2027 = vmatprep.subr.msk.bf16.mxu0 %vm66_vm0, %v392_v26  ;;  %v402_v27 = vsel %vm66_vm0, %v392_v26, 0  ;;  %vm1778_vm0 = vcmask 123904  }
 0x13d   :  { %1942 = vmatpush3.bf16.msra.mxu0 %v402_v27 }
 0x13e   :  { %v249_v42 = vsel %vm199_vm6, %v244_v34, %v248_v31  ;;  %v211_v45 = vsel %vm199_vm6, %v206_v38, %v210_v39 }
 0x13f   :  { %250 = vrot.lane.b32.xlu1 %v249_v42, %s2160_s16  ;;  %212 = vrot.lane.b32.xlu0 %v211_v45, %s2160_s16 }
 0x143   :  { %257 = vrot.lane.b32.xlu1 %v256_v57, %s2163_s23  ;;  %220 = vrot.lane.b32.xlu0 %v219_v58, %s2163_s23 }
 0x147   :  { %543 = vrot.lane.b32.xlu1 %v542_v61, %s2163_s23  ;;  %536 = vrot.lane.b32.xlu0 %v535_v0, %s2160_s16 }
 0x14b   :  { %578 = vrot.lane.b32.xlu1 %v577_v5, %s2163_s23  ;;  %571 = vrot.lane.b32.xlu0 %v570_v7, %s2160_s16  ;;  %v1805_v7 = vld [vmem:[#allocation5 + $0x2] ss:$0 sm:$0xff] }
 0x1b1   :  { %v251_v8 = vpop.permute.xlu1 %250  ;;  %v213_v9 = vpop.permute.xlu0 %212 }
 0x1b2   :  { %v260_v10 = vsel %vm59_vm1, %v2235_v17, %v251_v8  ;;  %v223_v12 = vsel %vm59_vm1, %v2239_v19, %v213_v9  ;;  %v596_v17 = vsel %vm275_vm5, %v2043_v20, 0 }
 0x1b5   :  { %v258_v11 = vpop.permute.xlu1 %257  ;;  %v221_v14 = vpop.permute.xlu0 %220 }
 0x1b6   :  { %v262_v13 = vsel %vm224_vm8, %v260_v10, %v258_v11  ;;  %v226_v15 = vsel %vm224_vm8, %v223_v12, %v221_v14  ;;  %v1806_v12 = vld [vmem:[#allocation5 + $0x3] ss:$0 sm:$0xff] }
 0x1b7   :  { %1937 = vmatprep.mubr.msk.bf16.mxu1 %vm270_vm9, %v226_v15 }
 0x1b8   :  { %1938 = vmatmul.mubr.msk.bf16.vlgmr.msra.gmra.mxu1 %vm270_vm9, %v262_v13 }
 0x1b9   :  { %v537_v16 = vpop.permute.xlu0 %536  ;;  %v544_v18 = vpop.permute.xlu1 %543  ;;  %1948 = vmatpush3.bf16.msra.mxu1 %v596_v17 }
 0x1ba   :  { %v546_v21 = vsel %vm59_vm1, %v522_v3, %v537_v16 }
 0x1bb   :  { %v548_v22 = vsel %vm224_vm8, %v546_v21, %v544_v18 }
 0x1bc   :  { %1949 = vmatprep.mubr.msk.bf16.mxu1 %vm270_vm9, %v548_v22 }
 0x1bd   :  { %v572_v19 = vpop.permute.xlu0 %571  ;;  %v579_v24 = vpop.permute.xlu1 %578 }
 0x1be   :  { %v581_v23 = vsel %vm59_vm1, %v557_v52, %v572_v19 }
 0x1bf   :  { %v583_v25 = vsel %vm224_vm8, %v581_v23, %v579_v24 }
 0x1c0   :  { %1950 = vmatmul.mubr.msk.bf16.vlgmr.msra.gmra.mxu1 %vm270_vm9, %v583_v25 }
 0x278   :  { %v1939_v28 = vpop.f32.mrf.mxu1 }
 0x279   :  { %v333_v34 = vsel %vm59_vm1, %v1939_v28, 0.0 }
 0x27a   :  { %v313_v29 = vpop.f32.mrf.mxu1 }
 0x27b   :  { %v330_v2 = vsel %vm59_vm1, %v313_v29, 0.0 }
 0x27c   :  { %v1940_v30 = vpop.f32.mrf.mxu1 }
 0x27d   :  { %v335_v36 = vsel %vm59_vm1, %v1940_v30, 0.0 }
 0x27e   :  { %v316_v31 = vpop.f32.mrf.mxu1 }
 0x27f   :  { %v331_v32 = vsel %vm59_vm1, %v316_v31, 0.0 }
 0x280   :  { %v332_v33 = vadd.f32 %v331_v32, %v330_v2  ;;  %v1951_v27 = vpop.f32.mrf.mxu1  ;;  %v2045_v2 = vld [vmem:[#allocation2 + $0x20] sm:$0xff]  }
 0x282   :  { %v334_v35 = vadd.f32 %v333_v34, %v332_v33 }
 0x284   :  { %v336_v37 = vadd.f32 %v335_v36, %v334_v35  ;;  %v652_v35 = vsel %vm455_vm10, %v1951_v27, 0.0 }
 0x286   :  { %v337_v38 = vrot.slane %v336_v37, 4 }
 0x288   :  { %v338_v39 = vadd.f32 %v337_v38, %v336_v37 }
 0x28a   :  { %v339_v40 = vrot.slane %v338_v39, 2 }
 0x28c   :  { %v340_v41 = vadd.f32 %v339_v40, %v338_v39 }
 0x28e   :  { %v341_v42 = vrot.slane %v340_v41, 1 }
 0x290   :  { %v342_v3 = vadd.f32 %v341_v42, %v340_v41 }
 0x292   :  { %v343_v43 = vmul.f32 0.03125, %v342_v3 }
 0x294   :  { %v344_v44 = vsub.f32 %v313_v29, %v343_v43  ;;  %v345_v45 = vsub.f32 %v316_v31, %v343_v43  ;;  %v346_v46 = vsub.f32 %v1939_v28, %v343_v43  ;;  %v347_v47 = vsub.f32 %v1940_v30, %v343_v43  ;;  %v632_v28 = vpop.f32.mrf.mxu1  ;;  %v2044_v30 = vld [vmem:[#allocation2 + $0x28] sm:$0xff]  }
 0x295   :  { %1953 = vmatprep.subr.bf16.mxu0 %v2044_v30  ;;  %v649_v32 = vsel %vm455_vm10, %v632_v28, 0.0 }
 0x296   :  { %v348_v48 = vmul.f32 %v344_v44, %v344_v44  ;;  %v349_v49 = vmul.f32 %v345_v45, %v345_v45  ;;  %v350_v50 = vmul.f32 %v346_v46, %v346_v46  ;;  %v351_v51 = vmul.f32 %v347_v47, %v347_v47  ;;  %v1952_v29 = vpop.f32.mrf.mxu1 }
 0x297   :  { %v654_v37 = vsel %vm455_vm10, %v1952_v29, 0.0 }
 0x298   :  { %v352_v52 = vsel %vm59_vm1, %v348_v48, 0.0  ;;  %v353_v53 = vsel %vm59_vm1, %v349_v49, 0.0  ;;  %v355_v55 = vsel %vm59_vm1, %v350_v50, 0.0  ;;  %v357_v57 = vsel %vm59_vm1, %v351_v51, 0.0  ;;  %v635_v31 = vpop.f32.mrf.mxu1 }
 0x299   :  { %v354_v54 = vadd.f32 %v353_v53, %v352_v52  ;;  %v650_v33 = vsel %vm455_vm10, %v635_v31, 0.0 }
 0x29a   :  { %v651_v34 = vadd.f32 %v650_v33, %v649_v32 }
 0x29b   :  { %v356_v56 = vadd.f32 %v355_v55, %v354_v54 }
 0x29c   :  { %v653_v36 = vadd.f32 %v652_v35, %v651_v34 }
 0x29d   :  { %v358_v58 = vadd.f32 %v357_v57, %v356_v56 }
 0x29e   :  { %v655_v38 = vadd.f32 %v654_v37, %v653_v36 }
 0x29f   :  { %v359_v59 = vrot.slane %v358_v58, 4 }
 0x2a0   :  { %v656_v39 = vrot.slane %v655_v38, 4 }
 0x2a1   :  { %v360_v60 = vadd.f32 %v359_v59, %v358_v58 }
 0x2a2   :  { %v657_v40 = vadd.f32 %v656_v39, %v655_v38 }
 0x2a3   :  { %v361_v61 = vrot.slane %v360_v60, 2 }
 0x2a4   :  { %v658_v41 = vrot.slane %v657_v40, 2 }
 0x2a5   :  { %v362_v62 = vadd.f32 %v361_v61, %v360_v60 }
 0x2a6   :  { %v659_v42 = vadd.f32 %v658_v41, %v657_v40 }
 0x2a7   :  { %v363_v63 = vrot.slane %v362_v62, 1 }
 0x2a8   :  { %v660_v3 = vrot.slane %v659_v42, 1 }
 0x2a9   :  { %v364_v0 = vadd.f32 %v363_v63, %v362_v62 }
 0x2aa   :  { %v661_v43 = vadd.f32 %v660_v3, %v659_v42 }
 0x2ab   :  { %v365_v1 = vmul.f32 0.03125, %v364_v0 }
 0x2ad   :  { %v366_v4 = vadd.f32 1e-05, %v365_v1 }
 0x2af   :  { %2078 = vrsqrt.f32 %v366_v4 }
 0x2bc   :  { %v2079_v5 = vpop.eup %2078 }
 0x2bd   :  { %v369_v8 = vmul.f32 %v2079_v5, %v345_v45  ;;  %v368_v9 = vmul.f32 %v2079_v5, %v344_v44  ;;  %v370_v10 = vmul.f32 %v2079_v5, %v346_v46  ;;  %v371_v11 = vmul.f32 %v2079_v5, %v347_v47 }
 0x2be   :  { %v662_v44 = vmul.f32 0.03125, %v661_v43 }
 0x2bf   :  { %v377_v13 = vmul.f32 %v1805_v7, %v369_v8  ;;  %v376_v14 = vmul.f32 %v1805_v7, %v368_v9  ;;  %v378_v15 = vmul.f32 %v1805_v7, %v370_v10  ;;  %v379_v16 = vmul.f32 %v1805_v7, %v371_v11 }
 0x2c0   :  { %v2307_v45 = vsub.f32 %v632_v28, %v662_v44  ;;  %v2309_v46 = vsub.f32 %v635_v31, %v662_v44  ;;  %v2311_v47 = vsub.f32 %v1951_v27, %v662_v44  ;;  %v2317_v50 = vsub.f32 %v1952_v29, %v662_v44 }
 0x2c1   :  { %v384_v18 = vadd.f32 %v1806_v12, %v376_v14  ;;  %v385_v20 = vadd.f32 %v1806_v12, %v377_v13  ;;  %v386_v17 = vadd.f32 %v1806_v12, %v378_v15  ;;  %v387_v21 = vadd.f32 %v1806_v12, %v379_v16 }
 0x2c2   :  { %v667_v48 = vmul.f32 %v2307_v45, %v2307_v45  ;;  %v668_v49 = vmul.f32 %v2309_v46, %v2309_v46  ;;  %v669_v51 = vmul.f32 %v2311_v47, %v2311_v47  ;;  %v670_v57 = vmul.f32 %v2317_v50, %v2317_v50 }
 0x2c3   :  { %v388_v19 = vmax.f32 %v384_v18, 0.0  ;;  %v389_v22 = vmax.f32 %v385_v20, 0.0  ;;  %v390_v23 = vmax.f32 %v386_v17, 0.0  ;;  %v391_v24 = vmax.f32 %v387_v21, 0.0 }
 0x2c4   :  { %v671_v52 = vsel %vm455_vm10, %v667_v48, 0.0  ;;  %v672_v53 = vsel %vm455_vm10, %v668_v49, 0.0  ;;  %v674_v58 = vsel %vm455_vm10, %v669_v51, 0.0  ;;  %v676_v0 = vsel %vm455_vm10, %v670_v57, 0.0 }
 0x2c5   :  { %v393_v25 = vpack.c.bf16 %v389_v22, %v388_v19  ;;  %v394_v26 = vpack.c.bf16 %v391_v24, %v390_v23  ;;  %v673_v56 = vadd.f32 %v672_v53, %v671_v52 }
 0x2c7   :  { %1943 = vmatprep.mubr.msk.bf16.mxu0 %vm59_vm1, %v393_v25  ;;  %v675_v61 = vadd.f32 %v674_v58, %v673_v56 }
 0x2c8   :  { %1944 = vmatmul.mubr.msk.bf16.vlgmr.msra.gmra.mxu0 %vm59_vm1, %v394_v26 }
 0x2c9   :  { %1954 = vmatpush3.bf16.msra.mxu0 %v2044_v30  ;;  %v677_v7 = vadd.f32 %v676_v0, %v675_v61  ;;  %v1809_v61 = vld [vmem:[#allocation5 + $0x8] ss:$0 sm:$0xff] }
 0x2ca   :  { %1955 = vmatprep.subr.bf16.mxu0 %v2045_v2 }
 0x2cb   :  { %v678_v11 = vrot.slane %v677_v7, 4 }
 0x2cd   :  { %1956 = vmatpush3.bf16.msra.mxu0 %v2045_v2  ;;  %v679_v14 = vadd.f32 %v678_v11, %v677_v7 }
 0x2cf   :  { %v680_v18 = vrot.slane %v679_v14, 2 }
 0x2d1   :  { %v681_v21 = vadd.f32 %v680_v18, %v679_v14 }
 0x2d3   :  { %v682_v28 = vrot.slane %v681_v21, 1 }
 0x2d5   :  { %v683_v34 = vadd.f32 %v682_v28, %v681_v21 }
 0x2d7   :  { %v684_v38 = vmul.f32 0.03125, %v683_v34 }
 0x2d9   :  { %v685_v41 = vadd.f32 1e-05, %v684_v38 }
 0x2db   :  { %2080 = vrsqrt.f32 %v685_v41 }
 0x2e8   :  { %v2081_v49 = vpop.eup %2080 }
 0x2e9   :  { %v687_v51 = vmul.f32 %v2081_v49, %v2307_v45  ;;  %v688_v52 = vmul.f32 %v2081_v49, %v2309_v46  ;;  %v689_v53 = vmul.f32 %v2081_v49, %v2311_v47 }
 0x388   :  { %v1945_v54 = vpop.f32.mrf.mxu0 }
 0x389   :  { %v459_v4 = vsel %vm455_vm10, %v1945_v54, 0.0 }
 0x38a   :  { %v438_v55 = vpop.f32.mrf.mxu0 }
 0x38b   :  { %v456_v62 = vsel %vm455_vm10, %v438_v55, 0.0 }
 0x38c   :  { %v1946_v59 = vpop.f32.mrf.mxu0 }
 0x38d   :  { %v461_v8 = vsel %vm455_vm10, %v1946_v59, 0.0 }
 0x38e   :  { %v441_v60 = vpop.f32.mrf.mxu0 }
 0x38f   :  { %v457_v63 = vsel %vm455_vm10, %v441_v60, 0.0 }
 0x390   :  { %v458_v1 = vadd.f32 %v457_v63, %v456_v62  ;;  %v1815_v62 = vld [vmem:[#allocation5 + $0xb] ss:$0 sm:$0xff] }
 0x392   :  { %v460_v5 = vadd.f32 %v459_v4, %v458_v1 }
 0x394   :  { %v462_v9 = vadd.f32 %v461_v8, %v460_v5  ;;  %v1810_v5 = vld [vmem:[#allocation5 + $0x9] ss:$0 sm:$0xff] }
 0x396   :  { %v463_v10 = vrot.slane %v462_v9, 4 }
 0x398   :  { %v464_v12 = vadd.f32 %v463_v10, %v462_v9 }
 0x39a   :  { %v465_v13 = vrot.slane %v464_v12, 2 }
 0x39c   :  { %v466_v15 = vadd.f32 %v465_v13, %v464_v12 }
 0x39e   :  { %v467_v16 = vrot.slane %v466_v15, 1 }
 0x3a0   :  { %v468_v20 = vadd.f32 %v467_v16, %v466_v15 }
 0x3a2   :  { %v469_v17 = vmul.f32 0.03125, %v468_v20 }
 0x3a4   :  { %v470_v19 = vsub.f32 %v438_v55, %v469_v17  ;;  %v471_v22 = vsub.f32 %v441_v60, %v469_v17  ;;  %v472_v23 = vsub.f32 %v1945_v54, %v469_v17  ;;  %v473_v24 = vsub.f32 %v1946_v59, %v469_v17  ;;  %v1814_v55 = vld [vmem:[#allocation5 + $0xa] ss:$0 sm:$0xff] }
 0x3a5   :  { %v690_v54 = vmul.f32 %v2081_v49, %v2317_v50  ;;  %v695_v57 = vmul.f32 %v1814_v55, %v687_v51  ;;  %v696_v58 = vmul.f32 %v1814_v55, %v688_v52  ;;  %v697_v59 = vmul.f32 %v1814_v55, %v689_v53 }
 0x3a6   :  { %v474_v25 = vmul.f32 %v470_v19, %v470_v19  ;;  %v475_v26 = vmul.f32 %v471_v22, %v471_v22  ;;  %v476_v27 = vmul.f32 %v472_v23, %v472_v23  ;;  %v477_v29 = vmul.f32 %v473_v24, %v473_v24 }
 0x3a7   :  { %v698_v60 = vmul.f32 %v1814_v55, %v690_v54  ;;  %v704_v47 = vadd.f32 %v1815_v62, %v696_v58  ;;  %v705_v9 = vadd.f32 %v1815_v62, %v697_v59  ;;  %v703_v10 = vadd.f32 %v1815_v62, %v695_v57 }
 0x3a8   :  { %v478_v30 = vsel %vm455_vm10, %v474_v25, 0.0  ;;  %v479_v31 = vsel %vm455_vm10, %v475_v26, 0.0  ;;  %v481_v32 = vsel %vm455_vm10, %v476_v27, 0.0  ;;  %v483_v35 = vsel %vm455_vm10, %v477_v29, 0.0 }
 0x3a9   :  { %v480_v2 = vadd.f32 %v479_v31, %v478_v30  ;;  %v706_v50 = vadd.f32 %v1815_v62, %v698_v60 }
 0x3ab   :  { %v482_v33 = vadd.f32 %v481_v32, %v480_v2 }
 0x3ad   :  { %v484_v36 = vadd.f32 %v483_v35, %v482_v33 }
 0x3af   :  { %v485_v37 = vrot.slane %v484_v36, 4 }
 0x3b1   :  { %v486_v39 = vadd.f32 %v485_v37, %v484_v36 }
 0x3b3   :  { %v487_v40 = vrot.slane %v486_v39, 2 }
 0x3b5   :  { %v488_v42 = vadd.f32 %v487_v40, %v486_v39 }
 0x3b7   :  { %v489_v3 = vrot.slane %v488_v42, 1 }
 0x3b9   :  { %v490_v43 = vadd.f32 %v489_v3, %v488_v42 }
 0x3bb   :  { %v491_v44 = vmul.f32 0.03125, %v490_v43 }
 0x3bd   :  { %v492_v48 = vadd.f32 1e-05, %v491_v44 }
 0x3bf   :  { %2082 = vrsqrt.f32 %v492_v48 }
 0x3cc   :  { %v2083_v56 = vpop.eup %2082 }
 0x3cd   :  { %v494_v63 = vmul.f32 %v2083_v56, %v470_v19  ;;  %v495_v0 = vmul.f32 %v2083_v56, %v471_v22  ;;  %v496_v1 = vmul.f32 %v2083_v56, %v472_v23  ;;  %v497_v4 = vmul.f32 %v2083_v56, %v473_v24 }
 0x3cf   :  { %v502_v45 = vmul.f32 %v1809_v61, %v494_v63  ;;  %v503_v7 = vmul.f32 %v1809_v61, %v495_v0  ;;  %v504_v46 = vmul.f32 %v1809_v61, %v496_v1  ;;  %v505_v8 = vmul.f32 %v1809_v61, %v497_v4 }
 0x3d1   :  { %v511_v11 = vadd.f32 %v1810_v5, %v503_v7  ;;  %v512_v12 = vadd.f32 %v1810_v5, %v504_v46  ;;  %v513_v13 = vadd.f32 %v1810_v5, %v505_v8  ;;  %v510_v14 = vadd.f32 %v1810_v5, %v502_v45  ;;  %v1820_v7 = vld [vmem:[#allocation5 + $0x10] ss:$0 sm:$0xff] }
 0x3d3   :  { %v708_v15 = vadd.f32 %v704_v47, %v511_v11  ;;  %v707_v16 = vadd.f32 %v703_v10, %v510_v14  ;;  %v709_v18 = vadd.f32 %v705_v9, %v512_v12  ;;  %v710_v20 = vadd.f32 %v706_v50, %v513_v13  ;;  %v1821_v50 = vld [vmem:[#allocation5 + $0x11] ss:$0 sm:$0xff] }
 0x3d5   :  { %v711_v17 = vmax.f32 %v707_v16, 0.0  ;;  %v712_v21 = vmax.f32 %v708_v15, 0.0  ;;  %v713_v19 = vmax.f32 %v709_v18, 0.0  ;;  %v714_v22 = vmax.f32 %v710_v20, 0.0 }
 0x3d7   :  { %v2339_v23 = vpack.c.bf16 %v712_v21, %v711_v17  ;;  %v2341_v24 = vpack.c.bf16 %v714_v22, %v713_v19 }
 0x3d9   :  { %1957 = vmatprep.mubr.msk.bf16.mxu0 %vm455_vm10, %v2339_v23  ;;  %v1261_v14 = vshrl.u32 %v2339_v23, 16  ;;  %v1338_v17 = vshrl.u32 %v2341_v24, 16 }
 0x3da   :  { %1958 = vmatmul.mubr.msk.bf16.vlgmr.msra.gmra.mxu0 %vm455_vm10, %v2341_v24 }
 0x49a   :  { %v1959_v25 = vpop.f32.mrf.mxu0 }
 0x49b   :  { %v793_v2 = vsel %vm455_vm10, %v1959_v25, 0.0 }
 0x49c   :  { %v773_v26 = vpop.f32.mrf.mxu0 }
 0x49d   :  { %v790_v29 = vsel %vm455_vm10, %v773_v26, 0.0 }
 0x49e   :  { %v1960_v27 = vpop.f32.mrf.mxu0 }
 0x49f   :  { %v795_v33 = vsel %vm455_vm10, %v1960_v27, 0.0 }
 0x4a0   :  { %v776_v28 = vpop.f32.mrf.mxu0 }
 0x4a1   :  { %v791_v30 = vsel %vm455_vm10, %v776_v28, 0.0 }
 0x4a2   :  { %v792_v31 = vadd.f32 %v791_v30, %v790_v29  ;;  %v1264_v29 = vshll.u32 %v2339_v23, 16 }
 0x4a4   :  { %v794_v32 = vadd.f32 %v793_v2, %v792_v31  ;;  %v1340_v2 = vrot.slane %v1338_v17, 7 }
 0x4a6   :  { %v796_v34 = vadd.f32 %v795_v33, %v794_v32  ;;  %v1341_v33 = vshll.u32 %v2341_v24, 16 }
 0x4a8   :  { %v797_v35 = vrot.slane %v796_v34, 4 }
 0x4aa   :  { %v798_v36 = vadd.f32 %v797_v35, %v796_v34 }
 0x4ac   :  { %v799_v37 = vrot.slane %v798_v36, 2 }
 0x4ae   :  { %v800_v38 = vadd.f32 %v799_v37, %v798_v36 }
 0x4b0   :  { %v801_v39 = vrot.slane %v800_v38, 1 }
 0x4b2   :  { %v802_v40 = vadd.f32 %v801_v39, %v800_v38  ;;  %v2164_v38 = vmov 0.0  }
 0x4b3   :  { %1967 = vmatprep.subr.bf16.mxu0 %v2164_v38  ;;  %1961 = vmatprep.subr.bf16.mxu1 %v2164_v38 }
 0x4b4   :  { %v803_v41 = vmul.f32 0.03125, %v802_v40  ;;  %1969 = vmatprep.mubr.msk.bf16.mxu0 %vm2165_vm11, %v2164_v38  ;;  %1963 = vmatprep.mubr.msk.bf16.mxu1 %vm2165_vm11, %v2164_v38 }
 0x4b6   :  { %v804_v42 = vsub.f32 %v773_v26, %v803_v41  ;;  %v805_v3 = vsub.f32 %v776_v28, %v803_v41  ;;  %v806_v43 = vsub.f32 %v1959_v25, %v803_v41  ;;  %v807_v44 = vsub.f32 %v1960_v27, %v803_v41 }
 0x4b7   :  { %v1263_v26 = vrot.slane %v1261_v14, 7  ;;  %v1343_v41 = vor.u32 %v1341_v33, %v1340_v2 }
 0x4b8   :  { %v808_v48 = vmul.f32 %v804_v42, %v804_v42  ;;  %v809_v49 = vmul.f32 %v805_v3, %v805_v3  ;;  %v810_v51 = vmul.f32 %v806_v43, %v806_v43  ;;  %v811_v52 = vmul.f32 %v807_v44, %v807_v44 }
 0x4b9   :  { %v1266_v32 = vor.u32 %v1264_v29, %v1263_v26 }
 0x4ba   :  { %v812_v53 = vsel %vm455_vm10, %v808_v48, 0.0  ;;  %v813_v54 = vsel %vm455_vm10, %v809_v49, 0.0  ;;  %v815_v56 = vsel %vm455_vm10, %v810_v51, 0.0  ;;  %v817_v58 = vsel %vm455_vm10, %v811_v52, 0.0 }
 0x4bb   :  { %v814_v55 = vadd.f32 %v813_v54, %v812_v53  ;;  %v2382_v53 = vsel %vm2223_vm4, 0, %v1343_v41  ;;  %v2051_v41 = vld [vmem:[#allocation2 + $0x30] sm:$0xff]  }
 0x4bc   :  { %v1349_v17 = vshrl.u32 %v2382_v53, 16 }
 0x4bd   :  { %v816_v57 = vadd.f32 %v815_v56, %v814_v55 }
 0x4bf   :  { %v818_v59 = vadd.f32 %v817_v58, %v816_v57 }
 0x4c1   :  { %v819_v60 = vrot.slane %v818_v59, 4 }
 0x4c3   :  { %v820_v61 = vadd.f32 %v819_v60, %v818_v59 }
 0x4c5   :  { %v821_v62 = vrot.slane %v820_v61, 2 }
 0x4c7   :  { %v822_v63 = vadd.f32 %v821_v62, %v820_v61 }
 0x4c9   :  { %v823_v0 = vrot.slane %v822_v63, 1 }
 0x4cb   :  { %v824_v1 = vadd.f32 %v823_v0, %v822_v63 }
 0x4cd   :  { %v825_v4 = vmul.f32 0.03125, %v824_v1  ;;  %v1270_v1 = vsel %vm2223_vm4, %v1263_v26, 0 }
 0x4cf   :  { %v826_v5 = vadd.f32 1e-05, %v825_v4 }
 0x4d1   :  { %2084 = vrsqrt.f32 %v826_v5  ;;  %v1351_v5 = vshll.u32 %v2382_v53, 16 }
 0x4de   :  { %v2085_v45 = vpop.eup %2084 }
 0x4df   :  { %v828_v46 = vmul.f32 %v2085_v45, %v804_v42  ;;  %v829_v8 = vmul.f32 %v2085_v45, %v805_v3  ;;  %v830_v47 = vmul.f32 %v2085_v45, %v806_v43  ;;  %v831_v9 = vmul.f32 %v2085_v45, %v807_v44 }
 0x4e0   :  { %v2365_v42 = vsel %vm2223_vm4, 0, %v1266_v32 }
 0x4e1   :  { %v836_v10 = vmul.f32 %v1820_v7, %v828_v46  ;;  %v837_v11 = vmul.f32 %v1820_v7, %v829_v8  ;;  %v838_v12 = vmul.f32 %v1820_v7, %v830_v47  ;;  %v839_v13 = vmul.f32 %v1820_v7, %v831_v9 }
 0x4e2   :  { %v1274_v54 = vshll.u32 %v2365_v42, 16  ;;  %v1287_v4 = vrot.slane %v2365_v42, 1  ;;  %v1288_v47 = vrot.slane %v1270_v1, 1 }
 0x4e3   :  { %v844_v15 = vadd.f32 %v1821_v50, %v836_v10  ;;  %v845_v16 = vadd.f32 %v1821_v50, %v837_v11  ;;  %v846_v18 = vadd.f32 %v1821_v50, %v838_v12  ;;  %v847_v20 = vadd.f32 %v1821_v50, %v839_v13 }
 0x4e4   :  { %v1276_v8 = vrot.slane %v1274_v54, 1  ;;  %v1272_v50 = vshrl.u32 %v2365_v42, 16  ;;  %v1279_v10 = vshll.u32 %v1270_v1, 16  ;;  %v1347_v11 = vsel %vm2223_vm4, %v1340_v2, 0  ;;  %v2414_v2 = vld [vmem:[#allocation2 + $0xa0] sm:$0xf] }
 0x4e5   :  { %v848_v21 = vmax.f32 %v844_v15, 0.0  ;;  %v849_v19 = vmax.f32 %v845_v16, 0.0  ;;  %v850_v22 = vmax.f32 %v846_v18, 0.0  ;;  %v851_v25 = vmax.f32 %v847_v20, 0.0 }
 0x4e6   :  { %v1364_v12 = vrot.slane %v2382_v53, 1  ;;  %v1289_v13 = vsel %vm216_vm7, %v1287_v4, %v1288_v47  ;;  %v1277_v15 = vor.u32 %v1276_v8, %v1272_v50  ;;  %v1353_v16 = vrot.slane %v1351_v5, 1 }
 0x4e7   :  { %v852_v27 = vpack.c.bf16 %v849_v19, %v848_v21  ;;  %v853_v28 = vpack.c.bf16 %v851_v25, %v850_v22  ;;  %v1365_v18 = vrot.slane %v1347_v11, 1  ;;  %v1281_v20 = vrot.slane %v1279_v10, 1 }
 0x4e8   :  { %v1356_v21 = vshll.u32 %v1347_v11, 16  ;;  %v1354_v25 = vor.u32 %v1353_v16, %v1349_v17 }
 0x4e9   :  { %v939_v30 = vshrl.u32 %v853_v28, 16  ;;  %v855_v31 = vshrl.u32 %v852_v27, 16  ;;  %v942_v35 = vshll.u32 %v853_v28, 16  ;;  %v858_v37 = vshll.u32 %v852_v27, 16 }
 0x4ea   :  { %v1366_v19 = vsel %vm216_vm7, %v1364_v12, %v1365_v18  ;;  %v1282_v22 = vsel %vm199_vm6, %v1277_v15, %v1281_v20  ;;  %v1358_v26 = vrot.slane %v1356_v21, 1 }
 0x4eb   :  { %v941_v34 = vrot.slane %v939_v30, 7  ;;  %v857_v36 = vrot.slane %v855_v31, 7 }
 0x4ec   :  { %v1359_v27 = vsel %vm199_vm6, %v1354_v25, %v1358_v26 }
 0x4ed   :  { %v944_v39 = vor.u32 %v942_v35, %v941_v34  ;;  %v948_v40 = vsel %vm2223_vm4, %v941_v34, 0  ;;  %v860_v23 = vor.u32 %v858_v37, %v857_v36  ;;  %v864_v43 = vsel %vm2223_vm4, %v857_v36, 0  ;;  %v2046_v36 = vld [vmem:[#allocation2 + $0x58] sm:$0xff]   ;;  %v2047_v37 = vld [vmem:[#allocation2 + $0x50] sm:$0xff]  }
 0x4ee   :  { %v966_v48 = vrot.slane %v948_v40, 1  ;;  %v957_v51 = vshll.u32 %v948_v40, 16  ;;  %v882_v59 = vrot.slane %v864_v43, 1  ;;  %v873_v0 = vshll.u32 %v864_v43, 16  ;;  %v2049_v40 = vld [vmem:[#allocation2 + $0x40] sm:$0xff]  }
 0x4ef   :  { %v947_v24 = vsel %vm2223_vm4, 0, %v944_v39  ;;  %v2371_v3 = vsel %vm2223_vm4, 0, %v860_v23  ;;  %v2048_v39 = vld [vmem:[#allocation2 + $0x48] sm:$0xff]   ;;  %v2050_v23 = vld [vmem:[#allocation2 + $0x38] sm:$0xff]  }
 0x4f0   :  { %v965_v44 = vrot.slane %v947_v24, 1  ;;  %v952_v49 = vshll.u32 %v947_v24, 16  ;;  %v868_v52 = vshll.u32 %v2371_v3, 16  ;;  %v950_v56 = vshrl.u32 %v947_v24, 16 }
 0x4f1   :  { %v881_v58 = vrot.slane %v2371_v3, 1  ;;  %v959_v62 = vrot.slane %v957_v51, 1  ;;  %v866_v63 = vshrl.u32 %v2371_v3, 16  ;;  %v875_v9 = vrot.slane %v873_v0, 1 }
 0x4f2   :  { %v967_v55 = vsel %vm216_vm7, %v965_v44, %v966_v48  ;;  %v954_v57 = vrot.slane %v952_v49, 1  ;;  %v870_v60 = vrot.slane %v868_v52, 1 }
 0x4f3   :  { %968 = vrot.lane.b32.xlu1 %v967_v55, %s2159_s15  ;;  %v883_v7 = vsel %vm216_vm7, %v881_v58, %v882_v59  ;;  %v2052_v58 = vld [vmem:[#allocation2 + $0x68] sm:$0xff]   ;;  %v2053_v59 = vld [vmem:[#allocation2 + $0x60] sm:$0xff]  }
 0x4f4   :  { %v955_v61 = vor.u32 %v954_v57, %v950_v56  ;;  %v871_v46 = vor.u32 %v870_v60, %v866_v63  ;;  %v2054_v60 = vld [vmem:[#allocation2 + $0x98] sm:$0xff]  }
 0x4f6   :  { %v960_v45 = vsel %vm199_vm6, %v955_v61, %v959_v62  ;;  %v876_v14 = vsel %vm199_vm6, %v871_v46, %v875_v9 }
 0x4f7   :  { %961 = vrot.lane.b32.xlu0 %v960_v45, %s2166_s0  ;;  %884 = vrot.lane.b32.xlu1 %v883_v7, %s2159_s15 }
 0x4fb   :  { %1290 = vrot.lane.b32.xlu1 %v1289_v13, %s2159_s15  ;;  %877 = vrot.lane.b32.xlu0 %v876_v14, %s2166_s0 }
 0x4ff   :  { %1367 = vrot.lane.b32.xlu1 %v1366_v19, %s2159_s15  ;;  %1283 = vrot.lane.b32.xlu0 %v1282_v22, %s2166_s0 }
 0x503   :  { %1360 = vrot.lane.b32.xlu0 %v1359_v27, %s2166_s0 }
 0x565   :  { %v969_v28 = vpop.permute.xlu1 %968 }
 0x569   :  { %v962_v29 = vpop.permute.xlu0 %961  ;;  %v885_v33 = vpop.permute.xlu1 %884 }
 0x56a   :  { %v971_v30 = vsel %vm455_vm10, %v947_v24, %v962_v29 }
 0x56b   :  { %v973_v31 = vsel %vm888_vm12, %v971_v30, %v969_v28  ;;  %v1831_v28 = vld [vmem:[#allocation5 + $0x12] ss:$0 sm:$0xff] }
 0x56c   :  { %1968 = vmatpush3.bf16.msra.mxu0 %v973_v31  ;;  %v1832_v31 = vld [vmem:[#allocation5 + $0x13] ss:$0 sm:$0xff] }
 0x56d   :  { %v878_v32 = vpop.permute.xlu0 %877  ;;  %1989 = vmatprep.subr.bf16.mxu0 %v2164_v38 }
 0x56e   :  { %v887_v34 = vsel %vm455_vm10, %v2371_v3, %v878_v32 }
 0x56f   :  { %v890_v35 = vsel %vm888_vm12, %v887_v34, %v885_v33  ;;  %1970 = vmatmul.mubr.msk.bf16.vlgmr.msra.gmra.mxu0 %vm893_vm13, %v2414_v2 }
 0x570   :  { %1962 = vmatpush3.bf16.msra.mxu1 %v890_v35  ;;  %1993 = vmatprep.mubr.msk.bf16.mxu0 %vm2165_vm11, %v2164_v38 }
 0x571   :  { %1973 = vmatprep.subr.bf16.mxu1 %v2164_v38  ;;  %1990 = vmatpush3.bf16.msra.mxu0 %v2052_v58  ;;  %v1284_v34 = vpop.permute.xlu0 %1283 }
 0x572   :  { %1991 = vmatprep.subr.bf16.mxu0 %v2164_v38 }
 0x573   :  { %1964 = vmatmul.mubr.msk.bf16.vlgmr.msra.gmra.mxu1 %vm893_vm13, %v2414_v2 }
 0x574   :  { %1974 = vmatpush3.bf16.msra.mxu1 %v2046_v36  ;;  %1985 = vmatprep.mubr.msk.bf16.mxu1 %vm2165_vm11, %v2164_v38 }
 0x575   :  { %1975 = vmatprep.subr.bf16.mxu1 %v2164_v38  ;;  %1992 = vmatpush3.bf16.msra.mxu0 %v2053_v59 }
 0x576   :  { %1997 = vmatprep.subr.bf16.mxu0 %v2164_v38 }
 0x578   :  { %1976 = vmatpush3.bf16.msra.mxu1 %v2047_v37 }
 0x579   :  { %1977 = vmatprep.subr.bf16.mxu1 %v2164_v38 }
 0x57c   :  { %1978 = vmatpush3.bf16.msra.mxu1 %v2048_v39 }
 0x57d   :  { %1979 = vmatprep.subr.bf16.mxu1 %v2164_v38 }
 0x580   :  { %1980 = vmatpush3.bf16.msra.mxu1 %v2049_v40  ;;  %v1293_v40 = vsel %vm455_vm10, %v2365_v42, %v1284_v34  ;;  %v2061_v34 = vld [vmem:[#allocation2 + $0xe0] sm:$0xff]  }
 0x581   :  { %1981 = vmatprep.subr.bf16.mxu1 %v2164_v38 }
 0x584   :  { %1982 = vmatpush3.bf16.msra.mxu1 %v2050_v23 }
 0x585   :  { %1983 = vmatprep.subr.bf16.mxu1 %v2164_v38 }
 0x588   :  { %1984 = vmatpush3.bf16.msra.mxu1 %v2051_v41  ;;  %v1291_v41 = vpop.permute.xlu1 %1290 }
 0x589   :  { %2009 = vmatprep.subr.bf16.mxu1 %v2164_v38 }
 0x62f   :  { %v1009_v24 = vpop.f32.mrf.mxu0 }
 0x630   :  { %v1015_v3 = vpack.c.bf16 %v1009_v24, %v1009_v24  ;;  %v1295_v24 = vsel %vm888_vm12, %v1293_v40, %v1291_v41  ;;  %v2066_v40 = vld [vmem:[#allocation2 + $0x108] sm:$0xff]   ;;  %v2068_v41 = vld [vmem:[#allocation2 + $0x100] sm:$0xff]  }
 0x631   :  { %v1971_v43 = vpop.f32.mrf.mxu0 }
 0x632   :  { %v1017_v44 = vrot.slane %v1015_v3, 4  ;;  %v1361_v3 = vpop.permute.xlu0 %1360 }
 0x633   :  { %v931_v48 = vpop.f32.mrf.mxu1  ;;  %v1012_v49 = vpop.f32.mrf.mxu0  ;;  %v1370_v43 = vsel %vm455_vm10, %v2382_v53, %v1361_v3  ;;  %v2057_v53 = vld [vmem:[#allocation2 + $0x80] sm:$0xff]  }
 0x634   :  { %v937_v51 = vpack.c.bf16 %v931_v48, %v931_v48  ;;  %v2055_v48 = vld [vmem:[#allocation2 + $0x90] sm:$0xff]   ;;  %v2056_v49 = vld [vmem:[#allocation2 + $0x88] sm:$0xff]  }
 0x635   :  { %v1965_v52 = vpop.f32.mrf.mxu1  ;;  %v1972_v54 = vpop.f32.mrf.mxu0 }
 0x636   :  { %v1021_v55 = vsel %vm1018_vm14, %v937_v51, %v1017_v44  ;;  %v1368_v44 = vpop.permute.xlu1 %1367  ;;  %v2058_v51 = vld [vmem:[#allocation2 + $0x78] sm:$0xff]   ;;  %v2059_v52 = vld [vmem:[#allocation2 + $0x70] sm:$0xff]  }
 0x637   :  { %v934_v56 = vpop.f32.mrf.mxu1  ;;  %1986 = vmatmul.mubr.msk.bf16.vlgmr.msra.gmra.mxu1 %vm1070_vm15, %v1021_v55  ;;  %v1372_v42 = vsel %vm888_vm12, %v1370_v43, %v1368_v44 }
 0x638   :  { %2021 = vmatprep.mubr.msk.bf16.mxu1 %vm2165_vm11, %v2164_v38  ;;  %2010 = vmatpush3.bf16.msra.mxu1 %v2054_v60 }
 0x639   :  { %v1966_v57 = vpop.f32.mrf.mxu1  ;;  %2011 = vmatprep.subr.bf16.mxu1 %v2164_v38 }
 0x63c   :  { %2012 = vmatpush3.bf16.msra.mxu1 %v2055_v48 }
 0x63d   :  { %2013 = vmatprep.subr.bf16.mxu1 %v2164_v38 }
 0x640   :  { %2014 = vmatpush3.bf16.msra.mxu1 %v2056_v49 }
 0x641   :  { %2015 = vmatprep.subr.bf16.mxu1 %v2164_v38 }
 0x644   :  { %2016 = vmatpush3.bf16.msra.mxu1 %v2057_v53 }
 0x645   :  { %2017 = vmatprep.subr.bf16.mxu1 %v2164_v38 }
 0x648   :  { %2018 = vmatpush3.bf16.msra.mxu1 %v2058_v51 }
 0x649   :  { %2019 = vmatprep.subr.bf16.mxu1 %v2164_v38 }
 0x64c   :  { %2020 = vmatpush3.bf16.msra.mxu1 %v2059_v52 }
 0x6f7   :  { %v1107_v61 = vpop.f32.mrf.mxu1 }
 0x6f8   :  { %v1116_v0 = vsel %vm455_vm10, %v1107_v61, 0.0 }
 0x6f9   :  { %v1987_v62 = vpop.f32.mrf.mxu1 }
 0x6fb   :  { %v1110_v63 = vpop.f32.mrf.mxu1 }
 0x6fc   :  { %v1117_v1 = vsel %vm455_vm10, %v1110_v63, 0.0 }
 0x6fd   :  { %v1118_v4 = vadd.f32 %v1117_v1, %v1116_v0  ;;  %v1988_v5 = vpop.f32.mrf.mxu1 }
 0x6ff   :  { %v1119_v45 = vrot.slane %v1118_v4, 4 }
 0x701   :  { %v1120_v7 = vadd.f32 %v1119_v45, %v1118_v4 }
 0x703   :  { %v1121_v46 = vrot.slane %v1120_v7, 2 }
 0x705   :  { %v1122_v8 = vadd.f32 %v1121_v46, %v1120_v7 }
 0x707   :  { %v1123_v47 = vrot.slane %v1122_v8, 1 }
 0x709   :  { %v1124_v9 = vadd.f32 %v1123_v47, %v1122_v8 }
 0x70b   :  { %v1125_v50 = vmul.f32 0.0625, %v1124_v9 }
 0x70d   :  { %v1126_v10 = vsub.f32 %v1107_v61, %v1125_v50  ;;  %v1127_v11 = vsub.f32 %v1110_v63, %v1125_v50 }
 0x70f   :  { %v1128_v12 = vmul.f32 %v1126_v10, %v1126_v10  ;;  %v1129_v13 = vmul.f32 %v1127_v11, %v1127_v11 }
 0x711   :  { %v1130_v14 = vsel %vm455_vm10, %v1128_v12, 0.0  ;;  %v1131_v15 = vsel %vm455_vm10, %v1129_v13, 0.0 }
 0x712   :  { %v1132_v16 = vadd.f32 %v1131_v15, %v1130_v14 }
 0x714   :  { %v1133_v18 = vrot.slane %v1132_v16, 4 }
 0x716   :  { %v1134_v20 = vadd.f32 %v1133_v18, %v1132_v16 }
 0x718   :  { %v1135_v17 = vrot.slane %v1134_v20, 2 }
 0x71a   :  { %v1136_v21 = vadd.f32 %v1135_v17, %v1134_v20 }
 0x71c   :  { %v1137_v19 = vrot.slane %v1136_v21, 1 }
 0x71e   :  { %v1138_v22 = vadd.f32 %v1137_v19, %v1136_v21 }
 0x720   :  { %v1139_v25 = vmul.f32 0.0625, %v1138_v22 }
 0x722   :  { %v1140_v26 = vadd.f32 1e-05, %v1139_v25 }
 0x724   :  { %2086 = vrsqrt.f32 %v1140_v26 }
 0x731   :  { %v2087_v27 = vpop.eup %2086 }
 0x732   :  { %v1142_v29 = vmul.f32 %v2087_v27, %v1126_v10  ;;  %v1143_v30 = vmul.f32 %v2087_v27, %v1127_v11 }
 0x734   :  { %v1148_v32 = vmul.f32 %v1831_v28, %v1142_v29  ;;  %v1149_v33 = vmul.f32 %v1831_v28, %v1143_v30 }
 0x736   :  { %v1154_v35 = vadd.f32 %v1832_v31, %v1148_v32  ;;  %v1155_v36 = vadd.f32 %v1832_v31, %v1149_v33  ;;  %v2060_v33 = vld [vmem:[#allocation2 + $0x120] sm:$0xff]  }
 0x738   :  { %v1156_v37 = vmax.f32 %v1154_v35, 0.0  ;;  %v1157_v39 = vmax.f32 %v1155_v36, 0.0  ;;  %v2062_v35 = vld [vmem:[#allocation2 + $0x118] sm:$0xff]  }
 0x739   :  { %v2063_v36 = vld [vmem:[#allocation2 + $0xd8] sm:$0xff]  }
 0x73a   :  { %v1162_v23 = vpack.c.bf16 %v1157_v39, %v1156_v37  ;;  %v2064_v37 = vld [vmem:[#allocation2 + $0x110] sm:$0xff]  }
 0x73b   :  { %v2065_v39 = vld [vmem:[#allocation2 + $0xd0] sm:$0xff]  }
 0x73c   :  { %1994 = vmatmul.mubr.msk.bf16.vlgmr.msra.gmra.mxu0 %vm455_vm10, %v1162_v23  ;;  %v2067_v23 = vld [vmem:[#allocation2 + $0xc8] sm:$0xff]  }
 0x73d   :  { %1998 = vmatpush3.bf16.msra.mxu0 %v1295_v24  ;;  %1999 = vmatprep.mubr.msk.bf16.mxu0 %vm2165_vm11, %v2164_v38 }
 0x73e   :  { %2003 = vmatprep.subr.bf16.mxu0 %v2164_v38 }
 0x744   :  { %2000 = vmatmul.mubr.msk.bf16.vlgmr.msra.gmra.mxu0 %vm893_vm13, %v2414_v2 }
 0x745   :  { %2004 = vmatpush3.bf16.msra.mxu0 %v1372_v42  ;;  %2005 = vmatprep.mubr.msk.bf16.mxu0 %vm2165_vm11, %v2164_v38 }
 0x746   :  { %1907 = vmatprep.subr.bf16.mxu0 %v2060_v33  ;;  %v2074_v33 = vld [vmem:[#allocation2 + $0xe8] sm:$0xff]  }
 0x74c   :  { %2006 = vmatmul.mubr.msk.bf16.vlgmr.msra.gmra.mxu0 %vm893_vm13, %v2414_v2 }
 0x74d   :  { %1908 = vmatpush3.bf16.msra.mxu0 %v2061_v34 }
 0x74e   :  { %1909 = vmatprep.subr.bf16.mxu0 %v2062_v35 }
 0x751   :  { %1910 = vmatpush3.bf16.msra.mxu0 %v2063_v36  ;;  %v2075_v36 = vld [vmem:[#allocation2 + $0xa8] sm:$0xff]  }
 0x752   :  { %1911 = vmatprep.subr.bf16.mxu0 %v2064_v37 }
 0x755   :  { %1912 = vmatpush3.bf16.msra.mxu0 %v2065_v39 }
 0x756   :  { %1913 = vmatprep.subr.bf16.mxu0 %v2066_v40 }
 0x759   :  { %1914 = vmatpush3.bf16.msra.mxu0 %v2067_v23 }
 0x75a   :  { %1915 = vmatprep.subr.bf16.mxu0 %v2068_v41 }
 0x7fc   :  { %v1212_v54 = vpop.f32.mrf.mxu0 }
 0x7fd   :  { %v1221_v56 = vsel %vm455_vm10, %v1212_v54, 0.0 }
 0x7fe   :  { %v1995_v2 = vpop.f32.mrf.mxu0 }
 0x800   :  { %v1215_v55 = vpop.f32.mrf.mxu0 }
 0x801   :  { %v1222_v57 = vsel %vm455_vm10, %v1215_v55, 0.0 }
 0x802   :  { %v1223_v58 = vadd.f32 %v1222_v57, %v1221_v56  ;;  %v1996_v59 = vpop.f32.mrf.mxu0 }
 0x804   :  { %v1224_v60 = vrot.slane %v1223_v58, 4  ;;  %v1331_v61 = vpop.f32.mrf.mxu0 }
 0x805   :  { %v1337_v47 = vpack.c.bf16 %v1331_v61, %v1331_v61 }
 0x806   :  { %v1225_v62 = vadd.f32 %v1224_v60, %v1223_v58  ;;  %v2001_v63 = vpop.f32.mrf.mxu0 }
 0x808   :  { %v1226_v0 = vrot.slane %v1225_v62, 2  ;;  %v1334_v1 = vpop.f32.mrf.mxu0 }
 0x80a   :  { %v1227_v4 = vadd.f32 %v1226_v0, %v1225_v62  ;;  %v2002_v5 = vpop.f32.mrf.mxu0 }
 0x80c   :  { %v1228_v38 = vrot.slane %v1227_v4, 1  ;;  %v1408_v45 = vpop.f32.mrf.mxu0 }
 0x80d   :  { %v1414_v7 = vpack.c.bf16 %v1408_v45, %v1408_v45 }
 0x80e   :  { %v1229_v46 = vadd.f32 %v1228_v38, %v1227_v4  ;;  %v2007_v8 = vpop.f32.mrf.mxu0 }
 0x80f   :  { %v1416_v9 = vrot.slane %v1414_v7, 4  ;;  %v1836_v8 = vld [vmem:[#allocation5 + $0x18] ss:$0 sm:$0xff] }
 0x810   :  { %v1230_v50 = vmul.f32 0.0625, %v1229_v46  ;;  %v1411_v10 = vpop.f32.mrf.mxu0 }
 0x811   :  { %v1419_v11 = vsel %vm1018_vm14, %v1337_v47, %v1416_v9  ;;  %v1847_v9 = vld [vmem:[#allocation5 + $0x1a] ss:$0 sm:$0xff] }
 0x812   :  { %v1231_v12 = vsub.f32 %v1212_v54, %v1230_v50  ;;  %v1232_v13 = vsub.f32 %v1215_v55, %v1230_v50  ;;  %v2008_v14 = vpop.f32.mrf.mxu0  ;;  %2022 = vmatmul.mubr.msk.bf16.vlgmr.msra.gmra.mxu1 %vm1070_vm15, %v1419_v11 }
 0x813   :  { %v1837_v14 = vld [vmem:[#allocation5 + $0x19] ss:$0 sm:$0xff] }
 0x814   :  { %v1233_v15 = vmul.f32 %v1231_v12, %v1231_v12  ;;  %v1234_v16 = vmul.f32 %v1232_v13, %v1232_v13 }
 0x816   :  { %v1235_v18 = vsel %vm455_vm10, %v1233_v15, 0.0  ;;  %v1236_v20 = vsel %vm455_vm10, %v1234_v16, 0.0  ;;  %v1848_v15 = vld [vmem:[#allocation5 + $0x1b] ss:$0 sm:$0xff]  ;;  %v2070_v16 = vld [vmem:[#allocation2 + $0xf8] sm:$0xff]  }
 0x817   :  { %v1237_v17 = vadd.f32 %v1236_v20, %v1235_v18 }
 0x819   :  { %v1238_v21 = vrot.slane %v1237_v17, 4 }
 0x81b   :  { %v1239_v19 = vadd.f32 %v1238_v21, %v1237_v17 }
 0x81d   :  { %v1240_v22 = vrot.slane %v1239_v19, 2 }
 0x81f   :  { %v1241_v25 = vadd.f32 %v1240_v22, %v1239_v19 }
 0x821   :  { %v1242_v26 = vrot.slane %v1241_v25, 1 }
 0x823   :  { %v1243_v27 = vadd.f32 %v1242_v26, %v1241_v25  ;;  %v2071_v25 = vld [vmem:[#allocation2 + $0xb8] sm:$0xff]   ;;  %v2072_v26 = vld [vmem:[#allocation2 + $0xf0] sm:$0xff]  }
 0x825   :  { %v1244_v28 = vmul.f32 0.0625, %v1243_v27 }
 0x827   :  { %v1245_v29 = vadd.f32 1e-05, %v1244_v28 }
 0x829   :  { %2088 = vrsqrt.f32 %v1245_v29 }
 0x836   :  { %v2089_v30 = vpop.eup %2088 }
 0x837   :  { %v1247_v31 = vmul.f32 %v2089_v30, %v1231_v12  ;;  %v1248_v32 = vmul.f32 %v2089_v30, %v1232_v13  ;;  %v2069_v13 = vld [vmem:[#allocation2 + $0xc0] sm:$0xff]  }
 0x838   :  { %1916 = vmatpush3.bf16.msra.mxu0 %v2069_v13 }
 0x839   :  { %v1253_v50 = vmul.f32 %v1836_v8, %v1247_v31  ;;  %v1254_v10 = vmul.f32 %v1836_v8, %v1248_v32  ;;  %1917 = vmatprep.subr.bf16.mxu0 %v2070_v16  ;;  %v2073_v31 = vld [vmem:[#allocation2 + $0xb0] sm:$0xff]  }
 0x83b   :  { %v1259_v17 = vadd.f32 %v1837_v14, %v1253_v50  ;;  %v1260_v21 = vadd.f32 %v1837_v14, %v1254_v10 }
 0x83c   :  { %1918 = vmatpush3.bf16.msra.mxu0 %v2071_v25 }
 0x83d   :  { %1919 = vmatprep.subr.bf16.mxu0 %v2072_v26 }
 0x840   :  { %1920 = vmatpush3.bf16.msra.mxu0 %v2073_v31 }
 0x841   :  { %1921 = vmatprep.subr.bf16.mxu0 %v2074_v33 }
 0x844   :  { %1922 = vmatpush3.bf16.msra.mxu0 %v2075_v36 }
 0x8d2   :  { %v1504_v24 = vpop.f32.mrf.mxu1 }
 0x8d3   :  { %v1513_v44 = vsel %vm455_vm10, %v1504_v24, 0.0 }
 0x8d4   :  { %v2023_v3 = vpop.f32.mrf.mxu1 }
 0x8d6   :  { %v1507_v43 = vpop.f32.mrf.mxu1 }
 0x8d7   :  { %v1514_v42 = vsel %vm455_vm10, %v1507_v43, 0.0 }
 0x8d8   :  { %v1515_v48 = vadd.f32 %v1514_v42, %v1513_v44  ;;  %v2024_v49 = vpop.f32.mrf.mxu1 }
 0x8da   :  { %v1516_v53 = vrot.slane %v1515_v48, 4 }
 0x8dc   :  { %v1517_v51 = vadd.f32 %v1516_v53, %v1515_v48 }
 0x8de   :  { %v1518_v52 = vrot.slane %v1517_v51, 2 }
 0x8e0   :  { %v1519_v54 = vadd.f32 %v1518_v52, %v1517_v51 }
 0x8e2   :  { %v1520_v2 = vrot.slane %v1519_v54, 1 }
 0x8e4   :  { %v1521_v55 = vadd.f32 %v1520_v2, %v1519_v54 }
 0x8e6   :  { %v1522_v56 = vmul.f32 0.0625, %v1521_v55 }
 0x8e8   :  { %v1523_v57 = vsub.f32 %v1504_v24, %v1522_v56  ;;  %v1524_v58 = vsub.f32 %v1507_v43, %v1522_v56 }
 0x8ea   :  { %v1525_v59 = vmul.f32 %v1523_v57, %v1523_v57  ;;  %v1526_v60 = vmul.f32 %v1524_v58, %v1524_v58 }
 0x8ec   :  { %v1527_v61 = vsel %vm455_vm10, %v1525_v59, 0.0  ;;  %v1528_v62 = vsel %vm455_vm10, %v1526_v60, 0.0 }
 0x8ed   :  { %v1529_v63 = vadd.f32 %v1528_v62, %v1527_v61  ;;  %v1849_v62 = vld [vmem:[#allocation5 + $0x20] ss:$0 sm:$0xff] }
 0x8ef   :  { %v1530_v0 = vrot.slane %v1529_v63, 4 }
 0x8f1   :  { %v1531_v1 = vadd.f32 %v1530_v0, %v1529_v63 }
 0x8f3   :  { %v1532_v4 = vrot.slane %v1531_v1, 2 }
 0x8f5   :  { %v1533_v5 = vadd.f32 %v1532_v4, %v1531_v1 }
 0x8f7   :  { %v1534_v38 = vrot.slane %v1533_v5, 1 }
 0x8f9   :  { %v1535_v45 = vadd.f32 %v1534_v38, %v1533_v5 }
 0x8fb   :  { %v1536_v7 = vmul.f32 0.0625, %v1535_v45 }
 0x8fd   :  { %v1537_v46 = vadd.f32 1e-05, %v1536_v7 }
 0x8ff   :  { %2090 = vrsqrt.f32 %v1537_v46 }
 0x90c   :  { %v2091_v47 = vpop.eup %2090 }
 0x90d   :  { %v1539_v11 = vmul.f32 %v2091_v47, %v1523_v57  ;;  %v1540_v12 = vmul.f32 %v2091_v47, %v1524_v58 }
 0x90f   :  { %v1545_v18 = vmul.f32 %v1847_v9, %v1539_v11  ;;  %v1546_v20 = vmul.f32 %v1847_v9, %v1540_v12 }
 0x911   :  { %v1551_v19 = vadd.f32 %v1848_v15, %v1545_v18  ;;  %v1552_v22 = vadd.f32 %v1848_v15, %v1546_v20 }
 0x913   :  { %v1553_v27 = vadd.f32 %v1551_v19, %v1259_v17  ;;  %v1554_v28 = vadd.f32 %v1552_v22, %v1260_v21 }
 0x915   :  { %v1555_v29 = vmax.f32 %v1553_v27, 0.0  ;;  %v1556_v30 = vmax.f32 %v1554_v28, 0.0 }
 0x917   :  { %v1557_v32 = vpack.c.bf16 %v1556_v30, %v1555_v29 }
 0x919   :  { %v1574_v34 = vrot.slane %v1557_v32, 3  ;;  %v1559_v35 = vshrl.u32 %v1557_v32, 16  ;;  %v1564_v37 = vrot.slane %v1557_v32, 1  ;;  %v1570_v3 = vrot.slane %v1557_v32, 2 }
 0x91b   :  { %1575 = vrot.lane.b32.xlu0 %v1574_v34, %s2159_s15  ;;  %1561 = vrot.lane.b32.xlu1 %v1559_v35, %s2166_s0  ;;  %v1571_v39 = vrot.slane %v1559_v35, 2  ;;  %v1577_v40 = vrot.slane %v1559_v35, 3  ;;  %v1567_v23 = vrot.slane %v1559_v35, 1 }
 0x91f   :  { %1565 = vrot.lane.b32.xlu1 %v1564_v37, %s2159_s15  ;;  %1572 = vrot.lane.b32.xlu0 %v1571_v39, %s2166_s0 }
 0x923   :  { %1578 = vrot.lane.b32.xlu0 %v1577_v40, %s2167_s2  ;;  %1568 = vrot.lane.b32.xlu1 %v1567_v23, %s2167_s2 }
 0x98d   :  { %v1576_v41 = vpop.permute.xlu0 %1575  ;;  %v1562_v24 = vpop.permute.xlu1 %1561 }
 0x98e   :  { %v1581_v48 = vsel %vm455_vm10, %v1557_v32, %v1562_v24 }
 0x991   :  { %v1566_v43 = vpop.permute.xlu1 %1565  ;;  %v1573_v44 = vpop.permute.xlu0 %1572 }
 0x992   :  { %v1589_v42 = vsel %vm455_vm10, %v1570_v3, %v1573_v44  ;;  %v1583_v49 = vsel %vm888_vm12, %v1581_v48, %v1566_v43 }
 0x993   :  { %v1591_v53 = vsel %vm888_vm12, %v1589_v42, %v1576_v41 }
 0x995   :  { %v1579_v51 = vpop.permute.xlu0 %1578  ;;  %v1569_v52 = vpop.permute.xlu1 %1568 }
 0x996   :  { %v1593_v54 = vsel %vm1070_vm15, %v1591_v53, %v1579_v51  ;;  %v1585_v2 = vsel %vm1070_vm15, %v1583_v49, %v1569_v52 }
 0x997   :  { %v1598_v55 = vshll.u32 %v1593_v54, 16  ;;  %v1595_v56 = vshll.u32 %v1585_v2, 16 }
 0x999   :  { %v1600_v57 = vrot.slane %v1598_v55, 4  ;;  %v1597_v58 = vrot.slane %v1595_v56, 4 }
 0x99b   :  { %v1604_v59 = vsel %vm2223_vm4, %v1593_v54, %v1600_v57  ;;  %v1603_v60 = vsel %vm2223_vm4, %v1585_v2, %v1597_v58 }
 0x99c   :  { %1770 = vmatprep.mubr.bf16.mxu0 %v1604_v59 }
 0x99d   :  { %1771 = vmatmul.mubr.bf16.vlgmr.msra.gmra.mxu0 %v1603_v60 }
 0xa5d   :  { %v1923_v61 = vpop.f32.mrf.mxu0 }
 0xa5f   :  { %v1924_v63 = vpop.f32.mrf.mxu0 }
 0xa60   :  { %v1925_v0 = vadd.f32 %v1924_v63, %v1923_v61 }
 0xa61   :  { %v1926_v1 = vpop.f32.mrf.mxu0 }
 0xa62   :  { %v1773_v4 = vadd.f32 %v1925_v0, %v1849_v62 }
 0xa63   :  { %v1927_v5 = vpop.f32.mrf.mxu0 }
 0xa64   :  { %1779 = vst.msk [vmem:[#allocation7] sm:$0x3] %vm1778_vm0, %v1773_v4 }
 0xa65   :  { %2143 = shalt.err (!%p2140_p0)
}
 0xa66   :  { %1789 = dma.vmem_to_hbm [thread:$0]  %s1787_s30, 32, %s2496_s3, [#allocation4]  }
 0xa67   :  { %2156 = dma.done.wait [#allocation4], 32  }
 0xa68   :  { %2157 = vsyncadd [#allocation4], 4294967264 }
 0xa69   :  { %1793 = vsyncpa [#allocation3], 1 }
 0xa6a   :  { %1794 = vsyncpa [#allocation6], 1 }
 0xa6b   :  { %1795 = vsyncpa [#allocation4], 1 }

</bundles_post_ra>
